<compile_context>
chip_gen: v5e
topology: v5e:2x2
jax: 0.10.0
libtpu: 0.0.40
codegen_flags: <defaults>
</compile_context>

<pallas_src>
import functools
import math

import jax
import jax.numpy as jnp
from jax import lax
from jax.experimental import pallas as pl
from jax.experimental.pallas import tpu as pltpu

LANE = 128


def _round_up(x, m):
    return (x + m - 1) // m * m


def _choose_cout_tile(cout_p, gs):
    """Largest of {256, 128} that holds whole GroupNorm groups and divides Cout_p."""
    lcm = LANE * gs // math.gcd(LANE, gs)
    for cand in (256, 128):
        if cand <= cout_p and cand % lcm == 0 and cout_p % cand == 0:
            return cand
    return cout_p


# ------------------------------ Pallas kernel --------------------------------

def _conv_gn_relu_kernel(x_ref, w_ref, b_ref, gamma_ref, beta_ref,
                         gmat_ref, gmatT_ref, o_ref,
                         *, KH, KW, stride, dilation, Ho, Wo, strip, eps):
    # x_ref:     [Hp, Wp, Cin]   spatially padded input (channels left at Cin).
    # w_ref:     [Kp, Ct]        im2col weights, rows ordered (kh, kw, ci), zero-padded.
    # b/gamma/beta_ref: [1, Ct]
    # gmat_ref:  [Ct, GLp]       one-hot channel -> local group (padded rows are zero).
    # gmatT_ref: [GLp, Ct]
    # o_ref:     [Ho, Wo, Ct]    output block; doubles as the VMEM store for the
    #                            pre-normalisation conv activations (no extra scratch).
    f32 = jnp.float32
    Cin = x_ref.shape[-1]
    Kp, Ct = w_ref.shape
    K = KH * KW * Cin
    n_hw = Ho * Wo
    n_full = Ho // strip
    rem = Ho - n_full * strip

    def load_patch(r0, rows):
        # im2col in-register: one lane-padded [rows*Wo, Kp] operand per strip.
        taps = []
        for kh in range(KH):
            for kw in range(KW):
                h0 = r0 * stride + kh * dilation
                w0 = kw * dilation
                if stride == 1:
                    p = x_ref[pl.ds(h0, rows), pl.ds(w0, Wo), :]
                else:
                    # Strided ref read: no over-fetch, no value-level compaction.
                    p = x_ref[pl.ds(h0, rows, stride), pl.ds(w0, Wo, stride), :]
                taps.append(p.astype(f32))
        if Kp > K:
            taps.append(jnp.zeros((rows, Wo, Kp - K), f32))
        patch = jnp.concatenate(taps, axis=-1)                  # [rows, Wo, Kp]
        return patch.reshape(rows * Wo, Kp)

    # ---- pass 1: conv (bias-free), stage pre-norm y in o_ref, per-channel sums ----
    # TODO(synk): on v6e/v7x cast patch/w to bf16 here (keep stats/normalise in f32)
    # for 2-4x MXU throughput once the accuracy budget allows it.
    def conv_strip(r0, rows, csum):
        patch = load_patch(r0, rows)
        y = jnp.dot(patch, w_ref[...], preferred_element_type=f32)   # [rows*Wo, Ct]
        o_ref[pl.ds(r0, rows)] = y.reshape(rows, Wo, Ct).astype(o_ref.dtype)
        return csum + jnp.sum(y, axis=0, keepdims=True)

    chan_sum = lax.fori_loop(0, n_full,
                             lambda s, c: conv_strip(s * strip, strip, c),
                             jnp.zeros((1, Ct), f32))
    if rem > 0:
        chan_sum = conv_strip(n_full * strip, rem, chan_sum)

    # ---- GroupNorm mean; conv bias folded in analytically (never materialised) ----
    bias_row = b_ref[...].astype(f32)
    chan_per_grp = jnp.sum(gmat_ref[...], axis=0, keepdims=True)       # [1, GLp]
    cnt = jnp.maximum(chan_per_grp * n_hw, 1.0)                        # elems / group
    g_sum = jnp.dot(chan_sum + n_hw * bias_row, gmat_ref[...],
                    preferred_element_type=f32)
    g_mean = g_sum / cnt
    mean_c = jnp.dot(g_mean, gmatT_ref[...], preferred_element_type=f32)
    center_c = mean_c - bias_row        # subtract this from the stored bias-free y

    # ---- pass 2: exact mean-subtracted variance (no E[x^2]-E[x]^2 cancellation) ----
    def ssq_strip(r0, rows, cssq):
        d = o_ref[pl.ds(r0, rows)].astype(f32) - center_c
        return cssq + jnp.sum(d * d, axis=(0, 1))[None, :]

    chan_cssq = lax.fori_loop(0, n_full,
                              lambda s, c: ssq_strip(s * strip, strip, c),
                              jnp.zeros((1, Ct), f32))
    if rem > 0:
        chan_cssq = ssq_strip(n_full * strip, rem, chan_cssq)

    g_var = jnp.dot(chan_cssq, gmat_ref[...], preferred_element_type=f32) / cnt
    g_inv = jnp.where(chan_per_grp > 0, lax.rsqrt(g_var + eps), 0.0)   # mask padded groups
    inv_c = jnp.dot(g_inv, gmatT_ref[...], preferred_element_type=f32)
    scale_c = inv_c * gamma_ref[...].astype(f32)
    shift_c = beta_ref[...].astype(f32) - center_c * scale_c

    # ---- pass 3: normalise + affine + ReLU ----
    def norm_strip(r0, rows):
        y = o_ref[pl.ds(r0, rows)].astype(f32)
        o_ref[pl.ds(r0, rows)] = jnp.maximum(y * scale_c + shift_c,
                                             0.0).astype(o_ref.dtype)

    def norm_body(s, carry):
        norm_strip(s * strip, strip)
        return carry

    lax.fori_loop(0, n_full, norm_body, 0)
    if rem > 0:
        norm_strip(n_full * strip, rem)


# --------------------------------- wrapper -----------------------------------

def conv2d_groupnorm_relu(x_nchw, weight_oihw, bias, gamma, beta,
                          *, stride, padding, dilation, n_groups, eps=1e-5):
    """Conv2d(k,k, stride, padding, dilation, bias) + GroupNorm(n_groups) + ReLU.

    x_nchw: [N, Cin, H, W]; weight_oihw: [Cout, Cin, KH, KW]; returns [N, Cout, Ho, Wo].
    """
    N, Cin, H, W = x_nchw.shape
    Cout, Cin_w, KH, KW = weight_oihw.shape
    assert Cin_w == Cin
    assert Cout % n_groups == 0, "GroupNorm requires Cout % n_groups == 0"
    gs = Cout // n_groups

    Ho = (H + 2 * padding - dilation * (KH - 1) - 1) // stride + 1
    Wo = (W + 2 * padding - dilation * (KW - 1) - 1) // stride + 1

    Cout_p = _round_up(Cout, LANE)
    ct = _choose_cout_tile(Cout_p, gs)           # channel tile (whole groups)
    n_ctiles = Cout_p // ct
    GL = -(-ct // gs)                            # local groups per tile (ceil)
    GLp = _round_up(GL, LANE)

    K = KH * KW * Cin
    Kp = _round_up(K, LANE)                      # lane-pad the contraction dim only

    # NCHW -> NHWC; pad spatial halo only (channels stay at Cin: no 128-lane pad).
    # TODO(synk): accept/produce NHWC directly when neighbouring layers do, to drop
    # the two wrapper transposes (full-tensor HBM round trips).
    x = jnp.transpose(x_nchw, (0, 2, 3, 1))
    if padding > 0:
        x = jnp.pad(x, ((0, 0), (padding, padding), (padding, padding), (0, 0)))
    Hp, Wp = H + 2 * padding, W + 2 * padding

    # OIHW -> im2col weights [Kp, Cout_p], rows ordered (kh, kw, ci).
    w = jnp.transpose(weight_oihw, (2, 3, 1, 0)).reshape(K, Cout)
    w = jnp.pad(w, ((0, Kp - K), (0, Cout_p - Cout))).astype(jnp.float32)

    b_p = jnp.pad(bias, (0, Cout_p - Cout)).reshape(1, Cout_p).astype(jnp.float32)
    g_p = jnp.pad(gamma, (0, Cout_p - Cout)).reshape(1, Cout_p).astype(jnp.float32)
    be_p = jnp.pad(beta, (0, Cout_p - Cout)).reshape(1, Cout_p).astype(jnp.float32)

    # Per-cout-tile one-hot channel -> local-group membership (padded channels -> none).
    local_grp = jnp.arange(ct) // gs
    gmat_tile = jax.nn.one_hot(local_grp, GLp, dtype=jnp.float32)        # [ct, GLp]
    chan_global = jnp.arange(n_ctiles)[:, None] * ct + jnp.arange(ct)[None, :]
    valid = (chan_global < Cout).astype(jnp.float32)                     # [n_ctiles, ct]
    gmat = gmat_tile[None] * valid[:, :, None]                           # [n_ctiles, ct, GLp]
    gmatT = jnp.transpose(gmat, (0, 2, 1))                               # [n_ctiles, GLp, ct]

    # Output-row strip: ~256 rows*Wo per MXU push (good for v6e/v7x's 256-wide MXU,
    # still fine on v5e's 128-wide MXU).
    strip = max(1, min(Ho, max(1, 256 // max(1, Wo))))

    kern = functools.partial(
        _conv_gn_relu_kernel, KH=KH, KW=KW, stride=stride, dilation=dilation,
        Ho=Ho, Wo=Wo, strip=strip, eps=float(eps))

    out_dtype = x_nchw.dtype
    itemsize = jnp.dtype(out_dtype).itemsize
    # Explicit per-step VMEM budget: double-buffered in/out blocks + weights + misc.
    need = (2 * Hp * Wp * Cin * x.dtype.itemsize
            + 2 * Ho * Wo * ct * itemsize
            + 2 * Kp * ct * 4
            + 2 * (3 * ct + 2 * ct * GLp) * 4)
    vmem_limit = int(min(56 * 2 ** 20, max(4 * need, 8 * 2 ** 20)))  # < v7x's 64 MiB

    out = pl.pallas_call(
        kern,
        out_shape=jax.ShapeDtypeStruct((N, Ho, Wo, Cout_p), out_dtype),
        grid=(N, n_ctiles),
        in_specs=[
            pl.BlockSpec((None, Hp, Wp, Cin), lambda n, c: (n, 0, 0, 0)),   # x (const over c)
            pl.BlockSpec((Kp, ct), lambda n, c: (0, c)),                     # im2col weights
            pl.BlockSpec((1, ct), lambda n, c: (0, c)),                      # bias
            pl.BlockSpec((1, ct), lambda n, c: (0, c)),                      # gamma
            pl.BlockSpec((1, ct), lambda n, c: (0, c)),                      # beta
            pl.BlockSpec((None, ct, GLp), lambda n, c: (c, 0, 0)),           # gmat
            pl.BlockSpec((None, GLp, ct), lambda n, c: (c, 0, 0)),           # gmat^T
        ],
        out_specs=pl.BlockSpec((None, Ho, Wo, ct), lambda n, c: (n, 0, 0, c)),
        compiler_params=pltpu.CompilerParams(
            dimension_semantics=("parallel", "parallel"),
            vmem_limit_bytes=vmem_limit),
    )(x, w, b_p, g_p, be_p, gmat, gmatT)

    if Cout_p != Cout:
        out = out[..., :Cout]
    # TODO(synk): keep NHWC end-to-end to drop this transpose.
    return jnp.transpose(out, (0, 3, 1, 2))


# ---------------------------- reference (pure JAX) ----------------------------

def ref_forward(x, weight, bias, gamma, beta, *, stride, padding, dilation,
                n_groups, eps=1e-5):
    y = lax.conv_general_dilated(
        x, weight, window_strides=(stride, stride),
        padding=[(padding, padding), (padding, padding)],
        rhs_dilation=(dilation, dilation),
        dimension_numbers=("NCHW", "OIHW", "NCHW"))
    y = y + bias[None, :, None, None]
    N, C, Ho, Wo = y.shape
    yg = y.reshape(N, n_groups, C // n_groups, Ho, Wo)
    mean = yg.mean(axis=(2, 3, 4), keepdims=True)
    var = yg.var(axis=(2, 3, 4), keepdims=True)
    yn = ((yg - mean) / jnp.sqrt(var + eps)).reshape(N, C, Ho, Wo)
    return jax.nn.relu(yn * gamma[None, :, None, None] + beta[None, :, None, None])


# ------------------------------------ main ------------------------------------

if __name__ == "__main__":
    # conv2DGroupNormRelu(in_channels=4, n_filters=32, k_size=3, stride=1,
    #                     padding=1, bias=True, dilation=1, n_groups=16)
    N, Cin, H, W = 2, 4, 16, 16
    Cout, k, stride, padding, dilation, n_groups = 32, 3, 1, 1, 1, 16

    key = jax.random.PRNGKey(0)
    kx, kw, kb, kg, kbe = jax.random.split(key, 5)
    x = jax.random.normal(kx, (N, Cin, H, W), jnp.float32)
    weight = 0.1 * jax.random.normal(kw, (Cout, Cin, k, k), jnp.float32)
    bias = 0.1 * jax.random.normal(kb, (Cout,), jnp.float32)
    gamma = 1.0 + 0.1 * jax.random.normal(kg, (Cout,), jnp.float32)
    beta = 0.1 * jax.random.normal(kbe, (Cout,), jnp.float32)

    fwd = jax.jit(functools.partial(
        conv2d_groupnorm_relu, stride=stride, padding=padding,
        dilation=dilation, n_groups=n_groups))
    out = jax.block_until_ready(fwd(x, weight, bias, gamma, beta))

    ref = jax.block_until_ready(
        ref_forward(x, weight, bias, gamma, beta, stride=stride,
                    padding=padding, dilation=dilation, n_groups=n_groups))

    assert out.shape == ref.shape, (out.shape, ref.shape)
    err = float(jnp.max(jnp.abs(out - ref)))
    assert jnp.allclose(out, ref, atol=1e-3, rtol=1e-3), err

    print("KERNEL_OK")
</pallas_src>

<mosaic_0001>
module attributes {stable_mosaic.version = 11 : i64} {
  func.func @_conv_gn_relu_kernel(%arg0: i32, %arg1: i32, %arg2: memref<1x18x18x4xf32, #tpu.memory_space<vmem>>, %arg3: memref<128x128xf32, #tpu.memory_space<vmem>>, %arg4: memref<1x128xf32, #tpu.memory_space<vmem>>, %arg5: memref<1x128xf32, #tpu.memory_space<vmem>>, %arg6: memref<1x128xf32, #tpu.memory_space<vmem>>, %arg7: memref<1x128x128xf32, #tpu.memory_space<vmem>>, %arg8: memref<1x128x128xf32, #tpu.memory_space<vmem>>, %arg9: memref<1x16x16x128xf32, #tpu.memory_space<vmem>>) attributes {dimension_semantics = [#tpu.dimension_semantics<parallel>, #tpu.dimension_semantics<parallel>], iteration_bounds = array<i64: 2, 1>, scalar_prefetch = 0 : i64, scratch_operands = 0 : i64, tpu.core_type = #tpu.core_type<tc>, window_params = [{transform_indices = @transform_0, window_bounds = array<i64: 1, 18, 18, 4>}, {transform_indices = @transform_1, window_bounds = array<i64: 128, 128>}, {transform_indices = @transform_2, window_bounds = array<i64: 1, 128>}, {transform_indices = @transform_3, window_bounds = array<i64: 1, 128>}, {transform_indices = @transform_4, window_bounds = array<i64: 1, 128>}, {transform_indices = @transform_5, window_bounds = array<i64: 1, 128, 128>}, {transform_indices = @transform_6, window_bounds = array<i64: 1, 128, 128>}, {transform_indices = @transform_7, window_bounds = array<i64: 1, 16, 16, 128>}]} {
    %cst = arith.constant 0.000000e+00 : f32
    %0 = vector.broadcast %cst : f32 to vector<1x128xf32>
    %c0_i32 = arith.constant 0 : i32
    %c16_i32 = arith.constant 16 : i32
    %1 = arith.muli %c0_i32, %c16_i32 : i32
    %c1_i32 = arith.constant 1 : i32
    %2 = arith.muli %1, %c1_i32 : i32
    %c0_i32_0 = arith.constant 0 : i32
    %3 = arith.addi %2, %c0_i32_0 : i32
    %c0 = arith.constant 0 : index
    %4 = arith.index_cast %3 : i32 to index
    %c0_1 = arith.constant 0 : index
    %c0_2 = arith.constant 0 : index
    %5 = vector.load %arg2[%c0, %4, %c0_1, %c0_2] : memref<1x18x18x4xf32, #tpu.memory_space<vmem>>, vector<1x16x16x4xf32>
    %6 = vector.shape_cast %5 : vector<1x16x16x4xf32> to vector<16x16x4xf32>
    %c1_i32_3 = arith.constant 1 : i32
    %7 = arith.muli %1, %c1_i32_3 : i32
    %c0_i32_4 = arith.constant 0 : i32
    %8 = arith.addi %7, %c0_i32_4 : i32
    %c0_5 = arith.constant 0 : index
    %9 = arith.index_cast %8 : i32 to index
    %c1 = arith.constant 1 : index
    %c0_6 = arith.constant 0 : index
    %10 = vector.load %arg2[%c0_5, %9, %c1, %c0_6] : memref<1x18x18x4xf32, #tpu.memory_space<vmem>>, vector<1x16x16x4xf32>
    %11 = vector.shape_cast %10 : vector<1x16x16x4xf32> to vector<16x16x4xf32>
    %c1_i32_7 = arith.constant 1 : i32
    %12 = arith.muli %1, %c1_i32_7 : i32
    %c0_i32_8 = arith.constant 0 : i32
    %13 = arith.addi %12, %c0_i32_8 : i32
    %c0_9 = arith.constant 0 : index
    %14 = arith.index_cast %13 : i32 to index
    %c2 = arith.constant 2 : index
    %c0_10 = arith.constant 0 : index
    %15 = vector.load %arg2[%c0_9, %14, %c2, %c0_10] : memref<1x18x18x4xf32, #tpu.memory_space<vmem>>, vector<1x16x16x4xf32>
    %16 = vector.shape_cast %15 : vector<1x16x16x4xf32> to vector<16x16x4xf32>
    %c1_i32_11 = arith.constant 1 : i32
    %17 = arith.muli %1, %c1_i32_11 : i32
    %c1_i32_12 = arith.constant 1 : i32
    %18 = arith.addi %17, %c1_i32_12 : i32
    %c0_13 = arith.constant 0 : index
    %19 = arith.index_cast %18 : i32 to index
    %c0_14 = arith.constant 0 : index
    %c0_15 = arith.constant 0 : index
    %20 = vector.load %arg2[%c0_13, %19, %c0_14, %c0_15] : memref<1x18x18x4xf32, #tpu.memory_space<vmem>>, vector<1x16x16x4xf32>
    %21 = vector.shape_cast %20 : vector<1x16x16x4xf32> to vector<16x16x4xf32>
    %c1_i32_16 = arith.constant 1 : i32
    %22 = arith.muli %1, %c1_i32_16 : i32
    %c1_i32_17 = arith.constant 1 : i32
    %23 = arith.addi %22, %c1_i32_17 : i32
    %c0_18 = arith.constant 0 : index
    %24 = arith.index_cast %23 : i32 to index
    %c1_19 = arith.constant 1 : index
    %c0_20 = arith.constant 0 : index
    %25 = vector.load %arg2[%c0_18, %24, %c1_19, %c0_20] : memref<1x18x18x4xf32, #tpu.memory_space<vmem>>, vector<1x16x16x4xf32>
    %26 = vector.shape_cast %25 : vector<1x16x16x4xf32> to vector<16x16x4xf32>
    %c1_i32_21 = arith.constant 1 : i32
    %27 = arith.muli %1, %c1_i32_21 : i32
    %c1_i32_22 = arith.constant 1 : i32
    %28 = arith.addi %27, %c1_i32_22 : i32
    %c0_23 = arith.constant 0 : index
    %29 = arith.index_cast %28 : i32 to index
    %c2_24 = arith.constant 2 : index
    %c0_25 = arith.constant 0 : index
    %30 = vector.load %arg2[%c0_23, %29, %c2_24, %c0_25] : memref<1x18x18x4xf32, #tpu.memory_space<vmem>>, vector<1x16x16x4xf32>
    %31 = vector.shape_cast %30 : vector<1x16x16x4xf32> to vector<16x16x4xf32>
    %c1_i32_26 = arith.constant 1 : i32
    %32 = arith.muli %1, %c1_i32_26 : i32
    %c2_i32 = arith.constant 2 : i32
    %33 = arith.addi %32, %c2_i32 : i32
    %c0_27 = arith.constant 0 : index
    %34 = arith.index_cast %33 : i32 to index
    %c0_28 = arith.constant 0 : index
    %c0_29 = arith.constant 0 : index
    %35 = vector.load %arg2[%c0_27, %34, %c0_28, %c0_29] : memref<1x18x18x4xf32, #tpu.memory_space<vmem>>, vector<1x16x16x4xf32>
    %36 = vector.shape_cast %35 : vector<1x16x16x4xf32> to vector<16x16x4xf32>
    %c1_i32_30 = arith.constant 1 : i32
    %37 = arith.muli %1, %c1_i32_30 : i32
    %c2_i32_31 = arith.constant 2 : i32
    %38 = arith.addi %37, %c2_i32_31 : i32
    %c0_32 = arith.constant 0 : index
    %39 = arith.index_cast %38 : i32 to index
    %c1_33 = arith.constant 1 : index
    %c0_34 = arith.constant 0 : index
    %40 = vector.load %arg2[%c0_32, %39, %c1_33, %c0_34] : memref<1x18x18x4xf32, #tpu.memory_space<vmem>>, vector<1x16x16x4xf32>
    %41 = vector.shape_cast %40 : vector<1x16x16x4xf32> to vector<16x16x4xf32>
    %c1_i32_35 = arith.constant 1 : i32
    %42 = arith.muli %1, %c1_i32_35 : i32
    %c2_i32_36 = arith.constant 2 : i32
    %43 = arith.addi %42, %c2_i32_36 : i32
    %c0_37 = arith.constant 0 : index
    %44 = arith.index_cast %43 : i32 to index
    %c2_38 = arith.constant 2 : index
    %c0_39 = arith.constant 0 : index
    %45 = vector.load %arg2[%c0_37, %44, %c2_38, %c0_39] : memref<1x18x18x4xf32, #tpu.memory_space<vmem>>, vector<1x16x16x4xf32>
    %46 = vector.shape_cast %45 : vector<1x16x16x4xf32> to vector<16x16x4xf32>
    %cst_40 = arith.constant 0.000000e+00 : f32
    %47 = vector.broadcast %cst_40 : f32 to vector<16x16x92xf32>
    %48 = tpu.concatenate %6, %11, %16, %21, %26, %31, %36, %41, %46, %47 in 2 : vector<16x16x4xf32>, vector<16x16x4xf32>, vector<16x16x4xf32>, vector<16x16x4xf32>, vector<16x16x4xf32>, vector<16x16x4xf32>, vector<16x16x4xf32>, vector<16x16x4xf32>, vector<16x16x4xf32>, vector<16x16x92xf32> -> vector<16x16x128xf32>
    %49 = vector.shape_cast %48 : vector<16x16x128xf32> to vector<256x128xf32>
    %c0_41 = arith.constant 0 : index
    %c0_42 = arith.constant 0 : index
    %50 = vector.load %arg3[%c0_41, %c0_42] : memref<128x128xf32, #tpu.memory_space<vmem>>, vector<128x128xf32>
    %cst_43 = arith.constant dense<0.000000e+00> : vector<256x128xf32>
    %51 = tpu.matmul %49, %50, %cst_43 {dimension_numbers = #tpu.dot_dimension_numbers<[1], [0], [0], [1], [0, 0, 1, 1], [], []>} : vector<256x128xf32>, vector<128x128xf32>, vector<256x128xf32> -> vector<256x128xf32>
    %52 = vector.shape_cast %51 : vector<256x128xf32> to vector<16x16x128xf32>
    %c0_44 = arith.constant 0 : index
    %53 = arith.index_cast %1 : i32 to index
    %c0_45 = arith.constant 0 : index
    %c0_46 = arith.constant 0 : index
    %54 = vector.load %arg9[%c0_44, %53, %c0_45, %c0_46] : memref<1x16x16x128xf32, #tpu.memory_space<vmem>>, vector<1x16x16x128xf32>
    %55 = vector.shape_cast %54 : vector<1x16x16x128xf32> to vector<16x16x128xf32>
    %56 = vector.shape_cast %52 : vector<16x16x128xf32> to vector<1x16x16x128xf32>
    tpu.vector_store %arg9[%c0_44, %53, %c0_45, %c0_46], %56 {strides = array<i32>} : memref<1x16x16x128xf32, #tpu.memory_space<vmem>>, vector<1x16x16x128xf32>,
    %cst_47 = arith.constant dense<0.000000e+00> : vector<128xf32>
    %57 = vector.multi_reduction <add>, %51, %cst_47 [0] : vector<256x128xf32> to vector<128xf32>
    %58 = vector.shape_cast %57 : vector<128xf32> to vector<1x128xf32>
    %59 = arith.addf %0, %58 : vector<1x128xf32>
    %c1_i32_48 = arith.constant 1 : i32
    %c0_49 = arith.constant 0 : index
    %c0_50 = arith.constant 0 : index
    %60 = vector.load %arg4[%c0_49, %c0_50] : memref<1x128xf32, #tpu.memory_space<vmem>>, vector<1x128xf32>
    %c0_51 = arith.constant 0 : index
    %c0_52 = arith.constant 0 : index
    %c0_53 = arith.constant 0 : index
    %61 = vector.load %arg7[%c0_51, %c0_52, %c0_53] : memref<1x128x128xf32, #tpu.memory_space<vmem>>, vector<1x128x128xf32>
    %62 = vector.shape_cast %61 : vector<1x128x128xf32> to vector<128x128xf32>
    %cst_54 = arith.constant dense<0.000000e+00> : vector<128xf32>
    %63 = vector.multi_reduction <add>, %62, %cst_54 [0] : vector<128x128xf32> to vector<128xf32>
    %64 = vector.shape_cast %63 : vector<128xf32> to vector<1x128xf32>
    %cst_55 = arith.constant 2.560000e+02 : f32
    %65 = vector.broadcast %cst_55 : f32 to vector<1x128xf32>
    %66 = arith.mulf %64, %65 : vector<1x128xf32>
    %cst_56 = arith.constant 1.000000e+00 : f32
    %67 = vector.broadcast %cst_56 : f32 to vector<1x128xf32>
    %68 = arith.maximumf %66, %67 : vector<1x128xf32>
    %cst_57 = arith.constant 2.560000e+02 : f32
    %69 = vector.broadcast %cst_57 : f32 to vector<1x128xf32>
    %70 = arith.mulf %69, %60 : vector<1x128xf32>
    %71 = arith.addf %59, %70 : vector<1x128xf32>
    %c0_58 = arith.constant 0 : index
    %c0_59 = arith.constant 0 : index
    %c0_60 = arith.constant 0 : index
    %72 = vector.load %arg7[%c0_58, %c0_59, %c0_60] : memref<1x128x128xf32, #tpu.memory_space<vmem>>, vector<1x128x128xf32>
    %73 = vector.shape_cast %72 : vector<1x128x128xf32> to vector<128x128xf32>
    %cst_61 = arith.constant dense<0.000000e+00> : vector<1x128xf32>
    %74 = tpu.matmul %71, %73, %cst_61 {dimension_numbers = #tpu.dot_dimension_numbers<[1], [0], [0], [1], [0, 0, 1, 1], [], []>} : vector<1x128xf32>, vector<128x128xf32>, vector<1x128xf32> -> vector<1x128xf32>
    %75 = arith.divf %74, %68 : vector<1x128xf32>
    %c0_62 = arith.constant 0 : index
    %c0_63 = arith.constant 0 : index
    %c0_64 = arith.constant 0 : index
    %76 = vector.load %arg8[%c0_62, %c0_63, %c0_64] : memref<1x128x128xf32, #tpu.memory_space<vmem>>, vector<1x128x128xf32>
    %77 = vector.shape_cast %76 : vector<1x128x128xf32> to vector<128x128xf32>
    %cst_65 = arith.constant dense<0.000000e+00> : vector<1x128xf32>
    %78 = tpu.matmul %75, %77, %cst_65 {dimension_numbers = #tpu.dot_dimension_numbers<[1], [0], [0], [1], [0, 0, 1, 1], [], []>} : vector<1x128xf32>, vector<128x128xf32>, vector<1x128xf32> -> vector<1x128xf32>
    %79 = arith.subf %78, %60 : vector<1x128xf32>
    %cst_66 = arith.constant 0.000000e+00 : f32
    %80 = vector.broadcast %cst_66 : f32 to vector<1x128xf32>
    %c0_i32_67 = arith.constant 0 : i32
    %c16_i32_68 = arith.constant 16 : i32
    %81 = arith.muli %c0_i32_67, %c16_i32_68 : i32
    %c0_69 = arith.constant 0 : index
    %82 = arith.index_cast %81 : i32 to index
    %c0_70 = arith.constant 0 : index
    %c0_71 = arith.constant 0 : index
    %83 = vector.load %arg9[%c0_69, %82, %c0_70, %c0_71] : memref<1x16x16x128xf32, #tpu.memory_space<vmem>>, vector<1x16x16x128xf32>
    %84 = vector.shape_cast %83 : vector<1x16x16x128xf32> to vector<16x16x128xf32>
    %85 = vector.shape_cast %79 : vector<1x128xf32> to vector<1x1x128xf32>
    %86 = vector.broadcast %85 : vector<1x1x128xf32> to vector<16x16x128xf32>
    %87 = arith.subf %84, %86 : vector<16x16x128xf32>
    %88 = arith.mulf %87, %87 : vector<16x16x128xf32>
    %cst_72 = arith.constant dense<0.000000e+00> : vector<128xf32>
    %89 = vector.multi_reduction <add>, %88, %cst_72 [0, 1] : vector<16x16x128xf32> to vector<128xf32>
    %90 = vector.shape_cast %89 : vector<128xf32> to vector<1x128xf32>
    %91 = arith.addf %80, %90 : vector<1x128xf32>
    %c1_i32_73 = arith.constant 1 : i32
    %c0_74 = arith.constant 0 : index
    %c0_75 = arith.constant 0 : index
    %c0_76 = arith.constant 0 : index
    %92 = vector.load %arg7[%c0_74, %c0_75, %c0_76] : memref<1x128x128xf32, #tpu.memory_space<vmem>>, vector<1x128x128xf32>
    %93 = vector.shape_cast %92 : vector<1x128x128xf32> to vector<128x128xf32>
    %cst_77 = arith.constant dense<0.000000e+00> : vector<1x128xf32>
    %94 = tpu.matmul %91, %93, %cst_77 {dimension_numbers = #tpu.dot_dimension_numbers<[1], [0], [0], [1], [0, 0, 1, 1], [], []>} : vector<1x128xf32>, vector<128x128xf32>, vector<1x128xf32> -> vector<1x128xf32>
    %95 = arith.divf %94, %68 : vector<1x128xf32>
    %cst_78 = arith.constant 0.000000e+00 : f32
    %96 = vector.broadcast %cst_78 : f32 to vector<1x128xf32>
    %97 = arith.cmpf ogt, %64, %96 : vector<1x128xf32>
    %cst_79 = arith.constant 9.99999974E-6 : f32
    %98 = vector.broadcast %cst_79 : f32 to vector<1x128xf32>
    %99 = arith.addf %95, %98 : vector<1x128xf32>
    %100 = math.rsqrt %99 : vector<1x128xf32>
    %cst_80 = arith.constant 0.000000e+00 : f32
    %101 = vector.broadcast %cst_80 : f32 to vector<1x128xf32>
    %102 = arith.select %97, %100, %101 : vector<1x128xi1>, vector<1x128xf32>
    %c0_81 = arith.constant 0 : index
    %c0_82 = arith.constant 0 : index
    %c0_83 = arith.constant 0 : index
    %103 = vector.load %arg8[%c0_81, %c0_82, %c0_83] : memref<1x128x128xf32, #tpu.memory_space<vmem>>, vector<1x128x128xf32>
    %104 = vector.shape_cast %103 : vector<1x128x128xf32> to vector<128x128xf32>
    %cst_84 = arith.constant dense<0.000000e+00> : vector<1x128xf32>
    %105 = tpu.matmul %102, %104, %cst_84 {dimension_numbers = #tpu.dot_dimension_numbers<[1], [0], [0], [1], [0, 0, 1, 1], [], []>} : vector<1x128xf32>, vector<128x128xf32>, vector<1x128xf32> -> vector<1x128xf32>
    %c0_85 = arith.constant 0 : index
    %c0_86 = arith.constant 0 : index
    %106 = vector.load %arg5[%c0_85, %c0_86] : memref<1x128xf32, #tpu.memory_space<vmem>>, vector<1x128xf32>
    %107 = arith.mulf %105, %106 : vector<1x128xf32>
    %c0_87 = arith.constant 0 : index
    %c0_88 = arith.constant 0 : index
    %108 = vector.load %arg6[%c0_87, %c0_88] : memref<1x128xf32, #tpu.memory_space<vmem>>, vector<1x128xf32>
    %109 = arith.mulf %79, %107 : vector<1x128xf32>
    %110 = arith.subf %108, %109 : vector<1x128xf32>
    %c0_i32_89 = arith.constant 0 : i32
    %c16_i32_90 = arith.constant 16 : i32
    %111 = arith.muli %c0_i32_89, %c16_i32_90 : i32
    %c0_91 = arith.constant 0 : index
    %112 = arith.index_cast %111 : i32 to index
    %c0_92 = arith.constant 0 : index
    %c0_93 = arith.constant 0 : index
    %113 = vector.load %arg9[%c0_91, %112, %c0_92, %c0_93] : memref<1x16x16x128xf32, #tpu.memory_space<vmem>>, vector<1x16x16x128xf32>
    %114 = vector.shape_cast %113 : vector<1x16x16x128xf32> to vector<16x16x128xf32>
    %115 = vector.shape_cast %107 : vector<1x128xf32> to vector<1x1x128xf32>
    %116 = vector.broadcast %115 : vector<1x1x128xf32> to vector<16x16x128xf32>
    %117 = arith.mulf %114, %116 : vector<16x16x128xf32>
    %118 = vector.shape_cast %110 : vector<1x128xf32> to vector<1x1x128xf32>
    %119 = vector.broadcast %118 : vector<1x1x128xf32> to vector<16x16x128xf32>
    %120 = arith.addf %117, %119 : vector<16x16x128xf32>
    %cst_94 = arith.constant 0.000000e+00 : f32
    %121 = vector.broadcast %cst_94 : f32 to vector<16x16x128xf32>
    %122 = arith.maximumf %120, %121 : vector<16x16x128xf32>
    %c0_95 = arith.constant 0 : index
    %123 = arith.index_cast %111 : i32 to index
    %c0_96 = arith.constant 0 : index
    %c0_97 = arith.constant 0 : index
    %124 = vector.load %arg9[%c0_95, %123, %c0_96, %c0_97] : memref<1x16x16x128xf32, #tpu.memory_space<vmem>>, vector<1x16x16x128xf32>
    %125 = vector.shape_cast %124 : vector<1x16x16x128xf32> to vector<16x16x128xf32>
    %126 = vector.shape_cast %122 : vector<16x16x128xf32> to vector<1x16x16x128xf32>
    tpu.vector_store %arg9[%c0_95, %123, %c0_96, %c0_97], %126 {strides = array<i32>} : memref<1x16x16x128xf32, #tpu.memory_space<vmem>>, vector<1x16x16x128xf32>,
    %c1_i32_98 = arith.constant 1 : i32
    return
  }
  func.func @transform_0(%arg0: i32, %arg1: i32) -> (i32, i32, i32, i32) {
    %c0_i32 = arith.constant 0 : i32
    %c0_i32_0 = arith.constant 0 : i32
    %c0_i32_1 = arith.constant 0 : i32
    %c0_i32_2 = arith.constant 0 : i32
    return %arg0, %c0_i32, %c0_i32_0, %c0_i32_1 : i32, i32, i32, i32
  }
  func.func @transform_1(%arg0: i32, %arg1: i32) -> (i32, i32) {
    %c0_i32 = arith.constant 0 : i32
    %c0_i32_0 = arith.constant 0 : i32
    return %c0_i32, %arg1 : i32, i32
  }
  func.func @transform_2(%arg0: i32, %arg1: i32) -> (i32, i32) {
    %c0_i32 = arith.constant 0 : i32
    %c0_i32_0 = arith.constant 0 : i32
    return %c0_i32, %arg1 : i32, i32
  }
  func.func @transform_3(%arg0: i32, %arg1: i32) -> (i32, i32) {
    %c0_i32 = arith.constant 0 : i32
    %c0_i32_0 = arith.constant 0 : i32
    return %c0_i32, %arg1 : i32, i32
  }
  func.func @transform_4(%arg0: i32, %arg1: i32) -> (i32, i32) {
    %c0_i32 = arith.constant 0 : i32
    %c0_i32_0 = arith.constant 0 : i32
    return %c0_i32, %arg1 : i32, i32
  }
  func.func @transform_5(%arg0: i32, %arg1: i32) -> (i32, i32, i32) {
    %c0_i32 = arith.constant 0 : i32
    %c0_i32_0 = arith.constant 0 : i32
    %c0_i32_1 = arith.constant 0 : i32
    return %arg1, %c0_i32, %c0_i32_0 : i32, i32, i32
  }
  func.func @transform_6(%arg0: i32, %arg1: i32) -> (i32, i32, i32) {
    %c0_i32 = arith.constant 0 : i32
    %c0_i32_0 = arith.constant 0 : i32
    %c0_i32_1 = arith.constant 0 : i32
    return %arg1, %c0_i32, %c0_i32_0 : i32, i32, i32
  }
  func.func @transform_7(%arg0: i32, %arg1: i32) -> (i32, i32, i32, i32) {
    %c0_i32 = arith.constant 0 : i32
    %c0_i32_0 = arith.constant 0 : i32
    %c0_i32_1 = arith.constant 0 : i32
    return %arg0, %c0_i32, %c0_i32_0, %arg1 : i32, i32, i32, i32
  }
}

</mosaic_0001>

<bundles_post_ra>
// kernel: conv2d_groupnorm_relu.1
= control target key start
LH: loop header
LB: loop body
LE: loop exit
PB: predicated region body
PF: predicated region fallthrough
CT: control target
= control target key end

     0   :  { %s3206_s24 = smov 0   ;;  %s3208_s25 = smov 0   ;;  %s5015_s0 = inlined_call_operand.vmem [shape: f32[2,18,18,4], index: 0, kind: input, shape index: {}]   ;;  %s5016_s1 = inlined_call_operand.vmem [shape: f32[128,128], index: 1, kind: input, shape index: {}]   ;;  %s5017_s2 = inlined_call_operand.vmem [shape: f32[1,128], index: 2, kind: input, shape index: {}]   ;;  %s5018_s3 = inlined_call_operand.vmem [shape: f32[1,128], index: 3, kind: input, shape index: {}]   ;;  %s5019_s4 = inlined_call_operand.vmem [shape: f32[1,128], index: 4, kind: input, shape index: {}]   ;;  %s5020_s5 = inlined_call_operand.vmem [shape: f32[1,128,128], index: 5, kind: input, shape index: {}]   ;;  %s5021_s6 = inlined_call_operand.vmem [shape: f32[1,128,128], index: 6, kind: input, shape index: {}]   ;;  %s5022_s7 = inlined_call_operand.vmem [shape: f32[2,16,16,128], index: 7, kind: output, shape index: {}]  }
   0x1   :  { %s3210_s26 = smov 0  }
   0x2 LB: > { %s29_s27 = sadd.s32 1, %s3152_s25  ;;  %p2817_p0 = scmp.ge.s32.totalorder %s3156_s26, 1  ;;  %s3156_s26 = sphi %s3210_s26, %s17_s26   ;;  %s3152_s25 = sphi %s3208_s25, %s5030_s25   ;;  %s3148_s24 = sphi %s3206_s24, %s5029_s24  }
   0x3   : > { %p31_p1 = scmp.ge.s32.totalorder %s29_s27, 2  ;;  %p304_p2 = scmp.lt.s32.totalorder %s3156_s26, 3 }
   0x5   : > { %s5032_s27 = smov (%p31_p1, %s29_s27), 0  ;;  %p305_p3 = pnand %p2817_p0, %p304_p2 }
   0x7   : > { %308 = sbr.rel (%p305_p3) target bundleno = 1630 (0x65e), region = 48 }
   0xc   : > { %p362_p4 = scmp.lt.s32.totalorder %s3148_s24, 1  ;;  %s3158_s9 = smov 20   ;;  %v2024_v19 = vld [vmem:[%s5016_s1 + $0x78] sm:$0xff]  ;;  %v2023_v20 = vld [vmem:[%s5016_s1 + $0x70] sm:$0xff]  ;;  %v2022_v22 = vld [vmem:[%s5016_s1 + $0x68] sm:$0xff]  ;;  %vm1712_vm0 = vcmask 31744  }
   0xd   : > { %s3159_s10 = smov 12   ;;  %s3160_s11 = smov 4   ;;  %2025 = vmatpush.msra.mxu0 %v2024_v19  ;;  %3050 = vmatpush.msra.mxu2 %v2024_v19  ;;  %v2021_v23 = vld [vmem:[%s5016_s1 + $0x60] sm:$0xff]  ;;  %v2020_v24 = vld [vmem:[%s5016_s1 + $0x58] sm:$0xff]  ;;  %v2019_v28 = vld [vmem:[%s5016_s1 + $0x50] sm:$0xff]  ;;  %vm1745_vm1 = vcmask 64512  }
   0xe   : > { %s5034_s24 = smov (!%p362_p4, %s3148_s24), 1  ;;  %s3161_s12 = smov 24   ;;  %3051 = vmatpush.msra.mxu3 %v2024_v19  ;;  %3049 = vmatpush.msra.mxu1 %v2024_v19  ;;  %v2018_v29 = vld [vmem:[%s5016_s1 + $0x48] sm:$0xff]  ;;  %v2017_v30 = vld [vmem:[%s5016_s1 + $0x40] sm:$0xff]  ;;  %v2016_v31 = vld [vmem:[%s5016_s1 + $0x38] sm:$0xff]  ;;  %vm1778_vm2 = vcmask 97280  }
   0xf   : > { %s3097_s28 = smul.u32 432, %s5034_s24  ;;  %s3162_s13 = smov 16   ;;  %2026 = vmatpush.msra.mxu0 %v2023_v20  ;;  %3053 = vmatpush.msra.mxu2 %v2023_v20  ;;  %v2015_v35 = vld [vmem:[%s5016_s1 + $0x30] sm:$0xff]  ;;  %v2014_v36 = vld [vmem:[%s5016_s1 + $0x28] sm:$0xff]  ;;  %v2013_v38 = vld [vmem:[%s5016_s1 + $0x20] sm:$0xff]  ;;  %vm1811_vm3 = vcmask 130048  }
  0x10   : > { %s3163_s14 = smov 8   ;;  %s3164_s15 = smov 32   ;;  %3054 = vmatpush.msra.mxu3 %v2023_v20  ;;  %3052 = vmatpush.msra.mxu1 %v2023_v20  ;;  %v2012_v40 = vld [vmem:[%s5016_s1 + $0x18] sm:$0xff]  ;;  %v2011_v41 = vld [vmem:[%s5016_s1 + $0x10] sm:$0xff]  ;;  %v2010_v42 = vld [vmem:[%s5016_s1 + $0x8] sm:$0xff]  ;;  %vm1844_vm4 = vcmask 162816  }
  0x11   : > { %s3230_s8 = scalar_lea.vmem %s5015_s0, %s3097_s28  ;;  %s3165_s16 = smov 28   ;;  %2027 = vmatpush.msra.mxu0 %v2022_v22  ;;  %3056 = vmatpush.msra.mxu2 %v2022_v22  ;;  %v2009_v44 = vld [vmem:[%s5016_s1] sm:$0xff]  ;;  %vm1877_vm5 = vcmask 195584   ;;  %vm1910_vm6 = vcmask 228352   ;;  %vm1943_vm7 = vcmask 261120   ;;  %vm1976_vm8 = vcmask 293888  }
  0x12   : > { %v2885_v0 = vld [vmem:[%s3230_s8 + $0x1a] sm:$0xff]  ;;  %v3242_v3 = vld [vmem:[%s3230_s8 + $0x30] sm:$0xff]  ;;  %v462_v5 = vld [vmem:[%s3230_s8 + $0x2] sm:$0xff]  ;;  %3057 = vmatpush.msra.mxu3 %v2022_v22  ;;  %3055 = vmatpush.msra.mxu1 %v2022_v22  ;;  %s3048_s19 = sshll.u32 %s5034_s24, 8 }
  0x13   : > { %v3234_v1 = vld [vmem:[%s3230_s8 + $0x18] sm:$0xff]  ;;  %v430_v2 = vld [vmem:[%s3230_s8 + $0x1] sm:$0xff]  ;;  %1232 = vrot.lane.b32.xlu2 %v2885_v0, %s3158_s9  ;;  %v431_v7 = vld [vmem:[%s3230_s8 + $0x9] sm:$0xff]  ;;  %2028 = vmatpush.msra.mxu0 %v2021_v23  ;;  %s4151_s22 = scalar_lea.vmem %s5022_s7, %s3048_s19 }
  0x14   : > { %976 = vrot.lane.b32.xlu1 %v3234_v1, %s3159_s10  ;;  %720 = vrot.lane.b32.xlu0 %v430_v2, %s3160_s11  ;;  %v2853_v4 = vld [vmem:[%s3230_s8 + $0x19] sm:$0xff]  ;;  %v3255_v8 = vld [vmem:[%s3230_s8 + $0x31] sm:$0xff] }
  0x15   : > { %v3251_v6 = vld [vmem:[%s3230_s8 + $0x32] sm:$0xff]  ;;  %v3263_v9 = vld [vmem:[%s3230_s8 + $0x20] sm:$0xff]  ;;  %v463_v11 = vld [vmem:[%s3230_s8 + $0xa] sm:$0xff]  ;;  %3059 = vmatpush.msra.mxu2 %v2021_v23  ;;  %3060 = vmatpush.msra.mxu3 %v2021_v23 }
  0x16   : > { %v2854_v10 = vld [vmem:[%s3230_s8 + $0x21] sm:$0xff]  ;;  %v3272_v12 = vld [vmem:[%s3230_s8 + $0x38] sm:$0xff]  ;;  %v3297_v16 = vld [vmem:[%s3230_s8 + $0x49] sm:$0xff]  ;;  %3058 = vmatpush.msra.mxu1 %v2021_v23  ;;  %2029 = vmatpush.msra.mxu0 %v2020_v24 }
  0x17   : > { %v3275_v13 = vld [vmem:[%s3230_s8 + $0x39] sm:$0xff]  ;;  %v2886_v14 = vld [vmem:[%s3230_s8 + $0x22] sm:$0xff]  ;;  %v3300_v17 = vld [vmem:[%s3230_s8 + $0x4a] sm:$0xff]  ;;  %3062 = vmatpush.msra.mxu2 %v2020_v24  ;;  %3063 = vmatpush.msra.mxu3 %v2020_v24 }
  0x18   : > { %v3284_v15 = vld [vmem:[%s3230_s8 + $0x3a] sm:$0xff]  ;;  %v3303_v18 = vld [vmem:[%s3230_s8 + $0x48] sm:$0xff]  ;;  %v3340_v25 = vld [vmem:[%s3230_s8 + $0x50] sm:$0xff]  ;;  %3061 = vmatpush.msra.mxu1 %v2020_v24  ;;  %2030 = vmatpush.msra.mxu0 %v2019_v28 }
  0x19   : > { %v3322_v21 = vld [vmem:[%s3230_s8 + $0xa9] sm:$0xff]  ;;  %v3343_v26 = vld [vmem:[%s3230_s8 + $0xc0] sm:$0xff]  ;;  %3065 = vmatpush.msra.mxu2 %v2019_v28  ;;  %3066 = vmatpush.msra.mxu3 %v2019_v28  ;;  %v3370_v33 = vld [vmem:[%s3230_s8 + $0x52] sm:$0xff] }
  0x1a   : > { %v3346_v27 = vld [vmem:[%s3230_s8 + $0xaa] sm:$0xff]  ;;  %2031 = vmatpush.msra.mxu0 %v2018_v29  ;;  %3064 = vmatpush.msra.mxu1 %v2019_v28  ;;  %v3367_v32 = vld [vmem:[%s3230_s8 + $0xc1] sm:$0xff]  ;;  %v3416_v45 = vld [vmem:[%s3230_s8 + $0xd9] sm:$0xff] }
  0x1b   : > { %1360 = vrot.lane.b32.xlu2 %v3242_v3, %s3161_s12  ;;  %3068 = vmatpush.msra.mxu2 %v2018_v29  ;;  %v3373_v34 = vld [vmem:[%s3230_s8 + $0x51] sm:$0xff]  ;;  %v3393_v39 = vld [vmem:[%s3230_s8 + $0xc2] sm:$0xff]  ;;  %v3428_v48 = vld [vmem:[%s3230_s8 + $0xda] sm:$0xff] }
  0x1c   : > { %1104 = vrot.lane.b32.xlu1 %v2853_v4, %s3162_s13  ;;  %848 = vrot.lane.b32.xlu0 %v462_v5, %s3163_s14  ;;  %v3419_v46 = vld [vmem:[%s3230_s8 + $0xd8] sm:$0xff]  ;;  %v3438_v54 = vld [vmem:[%s3230_s8 + $0x60] sm:$0xff] }
  0x1d   : > { %3069 = vmatpush.msra.mxu3 %v2018_v29  ;;  %2032 = vmatpush.msra.mxu0 %v2017_v30  ;;  %v445_v49 = vld [vmem:[%s3230_s8 + $0xb1] sm:$0xff]  ;;  %v398_v55 = vld [vmem:[%s3230_s8] sm:$0xff]  ;;  %v3453_v63 = vld [vmem:[%s3230_s8 + $0xc9] sm:$0xff] }
  0x1e   : > { %3067 = vmatpush.msra.mxu1 %v2018_v29  ;;  %3071 = vmatpush.msra.mxu2 %v2017_v30  ;;  %v477_v53 = vld [vmem:[%s3230_s8 + $0xb2] sm:$0xff]  ;;  %v3450_v62 = vld [vmem:[%s3230_s8 + $0x61] sm:$0xff] }
  0x1f   : > { %3072 = vmatpush.msra.mxu3 %v2017_v30  ;;  %2033 = vmatpush.msra.mxu0 %v2016_v31  ;;  %v3457_v2 = vld [vmem:[%s3230_s8 + $0xc8] sm:$0xff]  ;;  %v3487_v29 = vld [vmem:[%s3230_s8 + $0xe0] sm:$0xff] }
  0x20   : > { %3070 = vmatpush.msra.mxu1 %v2017_v30  ;;  %3074 = vmatpush.msra.mxu2 %v2016_v31  ;;  %v3476_v19 = vld [vmem:[%s3230_s8 + $0x62] sm:$0xff] }
  0x21   : > { %2034 = vmatpush.msra.mxu0 %v2015_v35  ;;  %3075 = vmatpush.msra.mxu3 %v2016_v31  ;;  %v399_v20 = vld [vmem:[%s3230_s8 + $0x8] sm:$0xff] }
  0x22   : > { %3073 = vmatpush.msra.mxu1 %v2016_v31  ;;  %3077 = vmatpush.msra.mxu2 %v2015_v35 }
  0x23   : > { %722 = vrot.lane.b32.xlu2 %v431_v7, %s3160_s11  ;;  %2035 = vmatpush.msra.mxu0 %v2014_v36 }
  0x24   : > { %1616 = vrot.lane.b32.xlu1 %v3251_v6, %s3164_s15  ;;  %1488 = vrot.lane.b32.xlu0 %v3255_v8, %s3165_s16 }
  0x25   : > { %3078 = vmatpush.msra.mxu3 %v2015_v35  ;;  %2036 = vmatpush.msra.mxu0 %v2013_v38 }
  0x26   : > { %3076 = vmatpush.msra.mxu1 %v2015_v35  ;;  %3080 = vmatpush.msra.mxu2 %v2014_v36 }
  0x27   : > { %3081 = vmatpush.msra.mxu3 %v2014_v36  ;;  %2037 = vmatpush.msra.mxu0 %v2012_v40 }
  0x28   : > { %3079 = vmatpush.msra.mxu1 %v2014_v36  ;;  %3083 = vmatpush.msra.mxu2 %v2013_v38 }
  0x29   : > { %2038 = vmatpush.msra.mxu0 %v2011_v41  ;;  %3084 = vmatpush.msra.mxu3 %v2013_v38 }
  0x2a   : > { %3082 = vmatpush.msra.mxu1 %v2013_v38  ;;  %3086 = vmatpush.msra.mxu2 %v2012_v40 }
  0x2b   : > { %1106 = vrot.lane.b32.xlu2 %v2854_v10, %s3162_s13  ;;  %2039 = vmatpush.msra.mxu0 %v2010_v42 }
  0x2c   : > { %978 = vrot.lane.b32.xlu1 %v3263_v9, %s3159_s10  ;;  %850 = vrot.lane.b32.xlu0 %v463_v11, %s3163_s14 }
  0x2d   : > { %3087 = vmatpush.msra.mxu3 %v2012_v40  ;;  %2040 = vmatpush.msra.mxu0 %v2009_v44 }
  0x2e   : > { %3085 = vmatpush.msra.mxu1 %v2012_v40  ;;  %3089 = vmatpush.msra.mxu2 %v2011_v41  ;;  %v3500_v40 = vld [vmem:[%s3230_s8 + $0xe2] sm:$0xff] }
  0x2f   : > { %3090 = vmatpush.msra.mxu3 %v2011_v41 }
  0x30   : > { %3088 = vmatpush.msra.mxu1 %v2011_v41  ;;  %3092 = vmatpush.msra.mxu2 %v2010_v42  ;;  %v3503_v41 = vld [vmem:[%s3230_s8 + $0xe1] sm:$0xff] }
  0x31   : > { %3093 = vmatpush.msra.mxu3 %v2010_v42 }
  0x32   : > { %3091 = vmatpush.msra.mxu1 %v2010_v42  ;;  %3095 = vmatpush.msra.mxu2 %v2009_v44 }
  0x33   : > { %1490 = vrot.lane.b32.xlu2 %v3275_v13, %s3165_s16  ;;  %3096 = vmatpush.msra.mxu3 %v2009_v44 }
  0x34   : > { %1362 = vrot.lane.b32.xlu1 %v3272_v12, %s3161_s12  ;;  %1234 = vrot.lane.b32.xlu0 %v2886_v14, %s3158_s9 }
  0x35   : > { %3094 = vmatpush.msra.mxu1 %v2009_v44 }
  0x3b   : > { %852 = vrot.lane.b32.xlu2 %v2885_v0, %s3163_s14 }
  0x3c   : > { %724 = vrot.lane.b32.xlu1 %v2853_v4, %s3160_s11  ;;  %1618 = vrot.lane.b32.xlu0 %v3284_v15, %s3164_s15 }
  0x43   : > { %1236 = vrot.lane.b32.xlu2 %v3251_v6, %s3158_s9 }
  0x44   : > { %1108 = vrot.lane.b32.xlu1 %v3255_v8, %s3162_s13  ;;  %980 = vrot.lane.b32.xlu0 %v3242_v3, %s3159_s10 }
  0x4b   : > { %1620 = vrot.lane.b32.xlu2 %v3300_v17, %s3164_s15 }
  0x4c   : > { %1492 = vrot.lane.b32.xlu1 %v3297_v16, %s3165_s16  ;;  %1364 = vrot.lane.b32.xlu0 %v3303_v18, %s3161_s12 }
  0x53   : > { %982 = vrot.lane.b32.xlu2 %v3272_v12, %s3159_s10 }
  0x54   : > { %854 = vrot.lane.b32.xlu1 %v2886_v14, %s3163_s14  ;;  %726 = vrot.lane.b32.xlu0 %v2854_v10, %s3160_s11  ;;  %v3472_v14 = vld [vmem:[%s3230_s8 + $0xca] sm:$0xff] }
  0x5b   : > { %1238 = vrot.lane.b32.xlu2 %v3284_v15, %s3158_s9 }
  0x5c   : > { %748 = vrot.lane.b32.xlu1 %v3322_v21, %s3160_s11  ;;  %1110 = vrot.lane.b32.xlu0 %v3275_v13, %s3162_s13 }
  0x63   : > { %1004 = vrot.lane.b32.xlu2 %v3343_v26, %s3159_s10 }
  0x64   : > { %1366 = vrot.lane.b32.xlu1 %v3340_v25, %s3161_s12  ;;  %876 = vrot.lane.b32.xlu0 %v3346_v27, %s3163_s14 }
  0x6b   : > { %1622 = vrot.lane.b32.xlu2 %v3370_v33, %s3164_s15 }
  0x6c   : > { %1132 = vrot.lane.b32.xlu1 %v3367_v32, %s3162_s13  ;;  %1494 = vrot.lane.b32.xlu0 %v3373_v34, %s3165_s16 }
  0x6d   : > { %v3387_v37 = vpop.permute.xlu2 %1232 }
  0x73   : > { %856 = vrot.lane.b32.xlu2 %v3251_v6, %s3163_s14 }
  0x74   : > { %1260 = vrot.lane.b32.xlu1 %v3393_v39, %s3158_s9  ;;  %728 = vrot.lane.b32.xlu0 %v3255_v8, %s3160_s11 }
  0x75   : > { %v3410_v43 = vpop.permute.xlu2 %1360 }
  0x7b   : > { %1516 = vrot.lane.b32.xlu2 %v3416_v45, %s3165_s16 }
  0x7c   : > { %984 = vrot.lane.b32.xlu1 %v3303_v18, %s3159_s10  ;;  %1388 = vrot.lane.b32.xlu0 %v3419_v46, %s3161_s12 }
  0x7d   : > { %v723_v47 = vpop.permute.xlu2 %722 }
  0x7e   : > { %v1714_v24 = vsel %vm1712_vm0, %v399_v20, %v723_v47 }
  0x83   : > { %750 = vrot.lane.b32.xlu2 %v445_v49, %s3160_s11 }
  0x84   : > { %1644 = vrot.lane.b32.xlu1 %v3428_v48, %s3164_s15  ;;  %1112 = vrot.lane.b32.xlu0 %v3297_v16, %s3162_s13 }
  0x85   : > { %v1107_v51 = vpop.permute.xlu2 %1106 }
  0x86   : > { %v977_v50 = vpop.permute.xlu1 %976  ;;  %v721_v52 = vpop.permute.xlu0 %720 }
  0x87   : > { %v1713_v58 = vsel %vm1712_vm0, %v398_v55, %v721_v52 }
  0x8b   : > { %1368 = vrot.lane.b32.xlu2 %v3438_v54, %s3161_s12 }
  0x8c   : > { %878 = vrot.lane.b32.xlu1 %v477_v53, %s3163_s14  ;;  %1240 = vrot.lane.b32.xlu0 %v3300_v17, %s3158_s9 }
  0x8d   : > { %v1491_v57 = vpop.permute.xlu2 %1490 }
  0x8e   : > { %v1105_v56 = vpop.permute.xlu1 %1104  ;;  %v849_v59 = vpop.permute.xlu0 %848 }
  0x8f   : > { %v1746_v60 = vsel %vm1745_vm1, %v1713_v58, %v849_v59 }
  0x90   : > { %v1779_v61 = vsel %vm1778_vm2, %v1746_v60, %v977_v50 }
  0x91   : > { %v1812_v0 = vsel %vm1811_vm3, %v1779_v61, %v1105_v56  ;;  %v453_v56 = vld [vmem:[%s3230_s8 + $0x111] sm:$0xff] }
  0x92   : > { %v1845_v4 = vsel %vm1844_vm4, %v1812_v0, %v3387_v37  ;;  %v485_v0 = vld [vmem:[%s3230_s8 + $0x112] sm:$0xff] }
  0x93   : > { %1134 = vrot.lane.b32.xlu2 %v3453_v63, %s3162_s13  ;;  %v1878_v8 = vsel %vm1877_vm5, %v1845_v4, %v3410_v43 }
  0x94   : > { %1496 = vrot.lane.b32.xlu1 %v3450_v62, %s3165_s16  ;;  %1006 = vrot.lane.b32.xlu0 %v3457_v2, %s3159_s10 }
  0x95   : > { %v853_v6 = vpop.permute.xlu2 %852 }
  0x96   : > { %v1617_v5 = vpop.permute.xlu1 %1616  ;;  %v1489_v7 = vpop.permute.xlu0 %1488 }
  0x97   : > { %v1911_v10 = vsel %vm1910_vm6, %v1878_v8, %v1489_v7  ;;  %v3552_v8 = vld [vmem:[%s3230_s8 + $0x128] sm:$0xff] }
  0x98   : > { %v1944_v11 = vsel %vm1943_vm7, %v1911_v10, %v1617_v5  ;;  %v3543_v5 = vld [vmem:[%s3230_s8 + $0x69] sm:$0xff] }
  0x99   : > { %3013 = vmatmul.msk.f32.vlgmr.msra.gmra.mxu0 %vm1976_vm8, %v1944_v11  ;;  %v3555_v10 = vld [vmem:[%s3230_s8 + $0x6a] sm:$0xff] }
  0x9b   : > { %1262 = vrot.lane.b32.xlu2 %v3472_v14, %s3158_s9 }
  0x9c   : > { %730 = vrot.lane.b32.xlu1 %v3275_v13, %s3160_s11  ;;  %1624 = vrot.lane.b32.xlu0 %v3476_v19, %s3164_s15 }
  0x9d   : > { %v1237_v23 = vpop.permute.xlu2 %1236 }
  0x9e   : > { %v979_v22 = vpop.permute.xlu1 %978  ;;  %v851_v28 = vpop.permute.xlu0 %850 }
  0x9f   : > { %v1747_v30 = vsel %vm1745_vm1, %v1714_v24, %v851_v28 }
  0xa0   : > { %v1780_v13 = vsel %vm1778_vm2, %v1747_v30, %v979_v22 }
  0xa1   : > { %v1813_v37 = vsel %vm1811_vm3, %v1780_v13, %v1107_v51 }
  0xa3   : > { %986 = vrot.lane.b32.xlu2 %v3340_v25, %s3159_s10 }
  0xa4   : > { %1390 = vrot.lane.b32.xlu1 %v3487_v29, %s3161_s12  ;;  %858 = vrot.lane.b32.xlu0 %v3284_v15, %s3163_s14 }
  0xa5   : > { %v1621_v35 = vpop.permute.xlu2 %1620 }
  0xa6   : > { %v1363_v31 = vpop.permute.xlu1 %1362  ;;  %v1235_v36 = vpop.permute.xlu0 %1234 }
  0xa7   : > { %v1846_v38 = vsel %vm1844_vm4, %v1813_v37, %v1235_v36 }
  0xa8   : > { %v1879_v42 = vsel %vm1877_vm5, %v1846_v38, %v1363_v31  ;;  %v3578_v31 = vld [vmem:[%s3230_s8 + $0x12a] sm:$0xff] }
  0xa9   : > { %v1912_v44 = vsel %vm1910_vm6, %v1879_v42, %v1491_v57 }
  0xab   : > { %1646 = vrot.lane.b32.xlu2 %v3500_v40, %s3164_s15 }
  0xac   : > { %1114 = vrot.lane.b32.xlu1 %v3373_v34, %s3162_s13  ;;  %1518 = vrot.lane.b32.xlu0 %v3503_v41, %s3165_s16 }
  0xad   : > { %v983_v25 = vpop.permute.xlu2 %982 }
  0xae   : > { %v725_v15 = vpop.permute.xlu1 %724  ;;  %v1619_v43 = vpop.permute.xlu0 %1618 }
  0xaf   : > { %v1945_v47 = vsel %vm1943_vm7, %v1912_v44, %v1619_v43  ;;  %v1715_v49 = vsel %vm1712_vm0, %v3234_v1, %v725_v15  ;;  %v3527_v1 = vld [vmem:[%s3230_s8 + $0x68] sm:$0xff]  ;;  %v3598_v43 = vld [vmem:[%s3230_s8 + $0x140] sm:$0xff]  ;;  %v3602_v44 = vld [vmem:[%s3230_s8 + $0xf1] sm:$0xff] }
  0xb0   : > { %3014 = vmatmul.msk.f32.gmra.mxu0 %vm1976_vm8, %v1945_v47  ;;  %v1748_v52 = vsel %vm1745_vm1, %v1715_v49, %v853_v6 }
  0xb3   : > { %880 = vrot.lane.b32.xlu2 %v3393_v39, %s3163_s14 }
  0xb4   : > { %1242 = vrot.lane.b32.xlu1 %v3370_v33, %s3158_s9  ;;  %752 = vrot.lane.b32.xlu0 %v3367_v32, %s3160_s11 }
  0xb5   : > { %v1239_v51 = vpop.permute.xlu2 %1238 }
  0xb6   : > { %v1109_v50 = vpop.permute.xlu1 %1108  ;;  %v981_v53 = vpop.permute.xlu0 %980 }
  0xb7   : > { %v1781_v55 = vsel %vm1778_vm2, %v1748_v52, %v981_v53  ;;  %v3616_v53 = vld [vmem:[%s3230_s8 + $0xf2] sm:$0xff] }
  0xb8   : > { %v1814_v57 = vsel %vm1811_vm3, %v1781_v55, %v1109_v50  ;;  %v3611_v50 = vld [vmem:[%s3230_s8 + $0xa8] sm:$0xff] }
  0xb9   : > { %v1847_v59 = vsel %vm1844_vm4, %v1814_v57, %v1237_v23  ;;  %v3566_v23 = vld [vmem:[%s3230_s8 + $0x129] sm:$0xff] }
  0xbb   : > { %1008 = vrot.lane.b32.xlu2 %v3419_v46, %s3159_s10 }
  0xbc   : > { %766 = vrot.lane.b32.xlu1 %v453_v56, %s3160_s11  ;;  %1370 = vrot.lane.b32.xlu0 %v3527_v1, %s3161_s12 }
  0xbd   : > { %v3535_v39 = vpop.permute.xlu2 %1004 }
  0xbe   : > { %v1493_v32 = vpop.permute.xlu1 %1492  ;;  %v1365_v58 = vpop.permute.xlu0 %1364 }
  0xbf   : > { %v1880_v60 = vsel %vm1877_vm5, %v1847_v59, %v1365_v58 }
  0xc0   : > { %v1913_v61 = vsel %vm1910_vm6, %v1880_v60, %v1493_v32 }
  0xc1   : > { %v1946_v4 = vsel %vm1943_vm7, %v1913_v61, %v1621_v35  ;;  %v3582_v35 = vld [vmem:[%s3230_s8 + $0xf0] sm:$0xff]  ;;  %v3635_v61 = vld [vmem:[%s3230_s8 + $0x141] sm:$0xff] }
  0xc2   : > { %3015 = vmatmul.msk.f32.gmra.mxu0 %vm1976_vm8, %v1946_v4 }
  0xc3   : > { %1136 = vrot.lane.b32.xlu2 %v3416_v45, %s3162_s13 }
  0xc4   : > { %894 = vrot.lane.b32.xlu1 %v485_v0, %s3163_s14  ;;  %1498 = vrot.lane.b32.xlu0 %v3543_v5, %s3165_s16 }
  0xc5   : > { %v1623_v6 = vpop.permute.xlu2 %1622 }
  0xc6   : > { %v855_v46 = vpop.permute.xlu1 %854  ;;  %v727_v7 = vpop.permute.xlu0 %726 }
  0xc7   : > { %v1716_v24 = vsel %vm1712_vm0, %v3263_v9, %v727_v7 }
  0xc8   : > { %v1749_v30 = vsel %vm1745_vm1, %v1716_v24, %v855_v46 }
  0xc9   : > { %v1782_v9 = vsel %vm1778_vm2, %v1749_v30, %v983_v25  ;;  %v3660_v30 = vld [vmem:[%s3230_s8 + $0x79] sm:$0xff] }
  0xcb   : > { %1022 = vrot.lane.b32.xlu2 %v3552_v8, %s3159_s10 }
  0xcc   : > { %732 = vrot.lane.b32.xlu1 %v3297_v16, %s3160_s11  ;;  %1626 = vrot.lane.b32.xlu0 %v3555_v10, %s3164_s15 }
  0xcd   : > { %v3563_v20 = vpop.permute.xlu2 %856 }
  0xce   : > { %v749_v11 = vpop.permute.xlu1 %748  ;;  %v1111_v22 = vpop.permute.xlu0 %1110 }
  0xcf   : > { %v1727_v52 = vsel %vm1712_vm0, %v3611_v50, %v749_v11  ;;  %v454_v11 = vld [vmem:[%s3230_s8 + $0x121] sm:$0xff] }
  0xd3   : > { %1150 = vrot.lane.b32.xlu2 %v3566_v23, %s3162_s13 }
  0xd4   : > { %860 = vrot.lane.b32.xlu1 %v3300_v17, %s3163_s14  ;;  %1264 = vrot.lane.b32.xlu0 %v3428_v48, %s3158_s9  ;;  %v1815_v17 = vsel %vm1811_vm3, %v1782_v9, %v1111_v22  ;;  %v3649_v22 = vld [vmem:[%s3230_s8 + $0x142] sm:$0xff] }
  0xd5   : > { %v1517_v28 = vpop.permute.xlu2 %1516  ;;  %v1848_v36 = vsel %vm1844_vm4, %v1815_v17, %v1239_v51 }
  0xd6   : > { %v1367_v16 = vpop.permute.xlu1 %1366  ;;  %v877_v13 = vpop.permute.xlu0 %876 }
  0xd7   : > { %v1881_v42 = vsel %vm1877_vm5, %v1848_v36, %v1367_v16  ;;  %v1760_v55 = vsel %vm1745_vm1, %v1727_v52, %v877_v13 }
  0xd8   : > { %v1793_v58 = vsel %vm1778_vm2, %v1760_v55, %v3535_v39  ;;  %v3689_v55 = vld [vmem:[%s3230_s8 + $0xb0] sm:$0xff] }
  0xdb   : > { %1278 = vrot.lane.b32.xlu2 %v3578_v31, %s3158_s9 }
  0xdc   : > { %988 = vrot.lane.b32.xlu1 %v3438_v54, %s3159_s10  ;;  %1392 = vrot.lane.b32.xlu0 %v3582_v35, %s3161_s12 }
  0xdd   : > { %v3592_v38 = vpop.permute.xlu2 %750 }
  0xde   : > { %v1133_v37 = vpop.permute.xlu1 %1132  ;;  %v1495_v15 = vpop.permute.xlu0 %1494 }
  0xdf   : > { %v1914_v25 = vsel %vm1910_vm6, %v1881_v42, %v1495_v15  ;;  %v1826_v59 = vsel %vm1811_vm3, %v1793_v58, %v1133_v37  ;;  %v3674_v15 = vld [vmem:[%s3230_s8 + $0x7a] sm:$0xff] }
  0xe0   : > { %v1947_v54 = vsel %vm1943_vm7, %v1914_v25, %v1623_v6 }
  0xe1   : > { %3016 = vmatmul.msk.f32.gmra.mxu0 %vm1976_vm8, %v1947_v54 }
  0xe3   : > { %1406 = vrot.lane.b32.xlu2 %v3598_v43, %s3161_s12 }
  0xe4   : > { %1116 = vrot.lane.b32.xlu1 %v3450_v62, %s3162_s13  ;;  %1520 = vrot.lane.b32.xlu0 %v3602_v44, %s3165_s16 }
  0xe5   : > { %v1369_v49 = vpop.permute.xlu2 %1368 }
  0xe6   : > { %v1261_v47 = vpop.permute.xlu1 %1260  ;;  %v729_v51 = vpop.permute.xlu0 %728 }
  0xe7   : > { %v1859_v60 = vsel %vm1844_vm4, %v1826_v59, %v1261_v47  ;;  %v1717_v13 = vsel %vm1712_vm0, %v3242_v3, %v729_v51 }
  0xe8   : > { %v1750_v36 = vsel %vm1745_vm1, %v1717_v13, %v3563_v20 }
  0xeb   : > { %1244 = vrot.lane.b32.xlu2 %v3476_v19, %s3158_s9 }
  0xec   : > { %754 = vrot.lane.b32.xlu1 %v3453_v63, %s3160_s11  ;;  %1648 = vrot.lane.b32.xlu0 %v3616_v53, %s3164_s15  ;;  %v3631_v63 = vld [vmem:[%s3230_s8 + $0x78] sm:$0xff] }
  0xed   : > { %v3625_v57 = vpop.permute.xlu2 %1134 }
  0xee   : > { %v985_v56 = vpop.permute.xlu1 %984  ;;  %v1389_v32 = vpop.permute.xlu0 %1388 }
  0xef   : > { %v1892_v0 = vsel %vm1877_vm5, %v1859_v60, %v1389_v32  ;;  %v1783_v37 = vsel %vm1778_vm2, %v1750_v36, %v985_v56 }
  0xf0   : > { %v1925_v46 = vsel %vm1910_vm6, %v1892_v0, %v1517_v28  ;;  %v486_v28 = vld [vmem:[%s3230_s8 + $0x122] sm:$0xff]  ;;  %v3712_v0 = vld [vmem:[%s3230_s8 + $0xf8] sm:$0xff] }
  0xf3   : > { %1372 = vrot.lane.b32.xlu2 %v3631_v63, %s3161_s12 }
  0xf4   : > { %882 = vrot.lane.b32.xlu1 %v3472_v14, %s3163_s14  ;;  %1534 = vrot.lane.b32.xlu0 %v3635_v61, %s3165_s16 }
  0xf5   : > { %v1263_v4 = vpop.permute.xlu2 %1262 }
  0xf6   : > { %v1645_v39 = vpop.permute.xlu1 %1644  ;;  %v1113_v6 = vpop.permute.xlu0 %1112 }
  0xf7   : > { %v1958_v7 = vsel %vm1943_vm7, %v1925_v46, %v1645_v39  ;;  %v1816_v42 = vsel %vm1811_vm3, %v1783_v37, %v1113_v6 }
  0xf8   : > { %3027 = vmatmul.msk.f32.vlgmr.msra.gmra.mxu2 %vm1976_vm8, %v1958_v7 }
  0xfb   : > { %1010 = vrot.lane.b32.xlu2 %v3487_v29, %s3159_s10 }
  0xfc   : > { %768 = vrot.lane.b32.xlu1 %v454_v11, %s3160_s11  ;;  %1662 = vrot.lane.b32.xlu0 %v3649_v22, %s3164_s15 }
  0xfd   : > { %v3656_v24 = vpop.permute.xlu2 %986 }
  0xfe   : > { %v879_v14 = vpop.permute.xlu1 %878  ;;  %v1241_v16 = vpop.permute.xlu0 %1240 }
  0xff   : > { %v1849_v25 = vsel %vm1844_vm4, %v1816_v42, %v1241_v16  ;;  %v3729_v16 = vld [vmem:[%s3230_s8 + $0x90] sm:$0xff]  ;;  %v3760_v42 = vld [vmem:[%s3230_s8 + $0xfa] sm:$0xff] }
 0x100   : > { %v1882_v3 = vsel %vm1877_vm5, %v1849_v25, %v1369_v49  ;;  %v1728_v49 = vsel %vm1712_vm0, %v3689_v55, %v3592_v38  ;;  %v3709_v38 = vld [vmem:[%s3230_s8 + $0x139] sm:$0xff]  ;;  %5025 = vst [vmem:[#allocation2_spill] sm:$0xff] %v3729_v16  ;;  %v3763_v25 = vld [vmem:[%s3230_s8 + $0x150] sm:$0xff] }
 0x101   : > { %v1761_v58 = vsel %vm1745_vm1, %v1728_v49, %v879_v14 }
 0x103   : > { %1138 = vrot.lane.b32.xlu2 %v3503_v41, %s3162_s13 }
 0x104   : > { %896 = vrot.lane.b32.xlu1 %v486_v28, %s3163_s14  ;;  %1500 = vrot.lane.b32.xlu0 %v3660_v30, %s3165_s16  ;;  %v3732_v28 = vld [vmem:[%s3230_s8 + $0x13a] sm:$0xff] }
 0x105   : > { %v1647_v9 = vpop.permute.xlu2 %1646 }
 0x106   : > { %v1497_v29 = vpop.permute.xlu1 %1496  ;;  %v1007_v17 = vpop.permute.xlu0 %1006 }
 0x107   : > { %v1915_v47 = vsel %vm1910_vm6, %v1882_v3, %v1497_v29  ;;  %v1794_v60 = vsel %vm1778_vm2, %v1761_v58, %v1007_v17  ;;  %v3747_v17 = vld [vmem:[%s3230_s8 + $0xf9] sm:$0xff]  ;;  %v3780_v58 = vld [vmem:[%s3230_s8 + $0x151] sm:$0xff] }
 0x10b   : > { %740 = vrot.lane.b32.xlu2 %v3660_v30, %s3160_s11 }
 0x10c   : > { %734 = vrot.lane.b32.xlu1 %v3373_v34, %s3160_s11  ;;  %1628 = vrot.lane.b32.xlu0 %v3674_v15, %s3164_s15  ;;  %v3693_v34 = vld [vmem:[%s3230_s8 + $0x138] sm:$0xff] }
 0x10d   : > { %v3684_v54 = vpop.permute.xlu2 %880 }
 0x10e   : > { %v731_v20 = vpop.permute.xlu1 %730  ;;  %v1625_v51 = vpop.permute.xlu0 %1624 }
 0x10f   : > { %v1948_v52 = vsel %vm1943_vm7, %v1915_v47, %v1625_v51  ;;  %v1718_v3 = vsel %vm1712_vm0, %v3272_v12, %v731_v20 }
 0x110   : > { %3017 = vmatmul.msk.f32.gmra.mxu0 %vm1976_vm8, %v1948_v52 }
 0x113   : > { %862 = vrot.lane.b32.xlu2 %v3370_v33, %s3163_s14  ;;  %v1827_v33 = vsel %vm1811_vm3, %v1794_v60, %v3625_v57 }
 0x114   : > { %1266 = vrot.lane.b32.xlu1 %v3500_v40, %s3158_s9  ;;  %1024 = vrot.lane.b32.xlu0 %v3693_v34, %s3159_s10  ;;  %v1860_v39 = vsel %vm1844_vm4, %v1827_v33, %v1263_v4 }
 0x115   : > { %v3704_v32 = vpop.permute.xlu2 %1008 }
 0x116   : > { %v1391_v56 = vpop.permute.xlu1 %1390  ;;  %v859_v59 = vpop.permute.xlu0 %858 }
 0x117   : > { %v1893_v7 = vsel %vm1877_vm5, %v1860_v39, %v1391_v56  ;;  %v1751_v49 = vsel %vm1745_vm1, %v1718_v3, %v859_v59  ;;  %v3777_v56 = vld [vmem:[%s3230_s8 + $0x92] sm:$0xff] }
 0x11b   : > { %1394 = vrot.lane.b32.xlu2 %v3712_v0, %s3161_s12 }
 0x11c   : > { %1152 = vrot.lane.b32.xlu1 %v3709_v38, %s3162_s13  ;;  %868 = vrot.lane.b32.xlu0 %v3674_v15, %s3163_s14 }
 0x11d   : > { %v3723_v6 = vpop.permute.xlu2 %1136 }
 0x11e   : > { %v1115_v46 = vpop.permute.xlu1 %1114  ;;  %v1519_v11 = vpop.permute.xlu0 %1518 }
 0x11f   : > { %v1926_v57 = vsel %vm1910_vm6, %v1893_v7, %v1519_v11  ;;  %v3799_v7 = vld [vmem:[%s3230_s8 + $0x80] sm:$0xff] }
 0x120   : > { %v1959_v14 = vsel %vm1943_vm7, %v1926_v57, %v1647_v9  ;;  %v3744_v9 = vld [vmem:[%s3230_s8 + $0x91] sm:$0xff] }
 0x121   : > { %3028 = vmatmul.msk.f32.gmra.mxu2 %vm1976_vm8, %v1959_v14 }
 0x123   : > { %1280 = vrot.lane.b32.xlu2 %v3732_v28, %s3158_s9 }
 0x124   : > { %996 = vrot.lane.b32.xlu1 %v3729_v16, %s3159_s10  ;;  %990 = vrot.lane.b32.xlu0 %v3527_v1, %s3159_s10 }
 0x125   : > { %v3741_v13 = vpop.permute.xlu2 %1022 }
 0x126   : > { %v1243_v4 = vpop.permute.xlu1 %1242  ;;  %v753_v29 = vpop.permute.xlu0 %752 }
 0x12b   : > { %1124 = vrot.lane.b32.xlu2 %v3744_v9, %s3162_s13 }
 0x12c   : > { %1118 = vrot.lane.b32.xlu1 %v3543_v5, %s3162_s13  ;;  %1522 = vrot.lane.b32.xlu0 %v3747_v17, %s3165_s16 }
 0x12d   : > { %v3757_v36 = vpop.permute.xlu2 %1150 }
 0x12e   : > { %v3755_v1 = vpop.permute.xlu1 %766  ;;  %v1371_v37 = vpop.permute.xlu0 %1370 }
 0x133   : > { %756 = vrot.lane.b32.xlu2 %v3416_v45, %s3160_s11  ;;  %v1784_v45 = vsel %vm1778_vm2, %v1751_v49, %v3656_v24  ;;  %v1729_v49 = vsel %vm1712_vm0, %v3343_v26, %v753_v29  ;;  %v3838_v26 = vld [vmem:[%s3230_s8 + $0x82] sm:$0xff] }
 0x134   : > { %1650 = vrot.lane.b32.xlu1 %v3760_v42, %s3164_s15  ;;  %1408 = vrot.lane.b32.xlu0 %v3763_v25, %s3161_s12  ;;  %v1817_v60 = vsel %vm1811_vm3, %v1784_v45, %v1115_v46 }
 0x135   : > { %v3773_v51 = vpop.permute.xlu2 %1278  ;;  %v1850_v12 = vsel %vm1844_vm4, %v1817_v60, %v1243_v4  ;;  %v3810_v4 = vld [vmem:[%s3230_s8 + $0x152] sm:$0xff] }
 0x136   : > { %v895_v47 = vpop.permute.xlu1 %894  ;;  %v1499_v52 = vpop.permute.xlu0 %1498  ;;  %v1883_v20 = vsel %vm1877_vm5, %v1850_v12, %v1371_v37 }
 0x137   : > { %v1916_v24 = vsel %vm1910_vm6, %v1883_v20, %v1499_v52  ;;  %v3821_v52 = vld [vmem:[%s3230_s8 + $0x81] sm:$0xff] }
 0x13b   : > { %1536 = vrot.lane.b32.xlu2 %v3780_v58, %s3165_s16 }
 0x13c   : > { %1252 = vrot.lane.b32.xlu1 %v3777_v56, %s3158_s9  ;;  %1246 = vrot.lane.b32.xlu0 %v3555_v10, %s3158_s9 }
 0x13d   : > { %v1407_v33 = vpop.permute.xlu2 %1406 }
 0x13e   : > { %v3793_v59 = vpop.permute.xlu1 %732  ;;  %v1627_v39 = vpop.permute.xlu0 %1626 }
 0x13f   : > { %v1949_v46 = vsel %vm1943_vm7, %v1916_v24, %v1627_v39 }
 0x140   : > { %3018 = vmatmul.msk.f32.gmra.mxu0 %vm1976_vm8, %v1949_v46 }
 0x143   : > { %1380 = vrot.lane.b32.xlu2 %v3611_v50, %s3161_s12 }
 0x144   : > { %1374 = vrot.lane.b32.xlu1 %v3799_v7, %s3161_s12  ;;  %884 = vrot.lane.b32.xlu0 %v3428_v48, %s3163_s14 }
 0x145   : > { %v3807_v57 = vpop.permute.xlu2 %1244 }
 0x146   : > { %v861_v11 = vpop.permute.xlu1 %860  ;;  %v1265_v14 = vpop.permute.xlu0 %1264 }
 0x14b   : > { %1012 = vrot.lane.b32.xlu2 %v3582_v35, %s3159_s10 }
 0x14c   : > { %770 = vrot.lane.b32.xlu1 %v3566_v23, %s3160_s11  ;;  %1664 = vrot.lane.b32.xlu0 %v3810_v4, %s3164_s15  ;;  %v1762_v23 = vsel %vm1745_vm1, %v1729_v49, %v3684_v54  ;;  %v3850_v54 = vld [vmem:[%s3230_s8 + $0x110] sm:$0xff] }
 0x14d   : > { %v3818_v3 = vpop.permute.xlu2 %1372  ;;  %v1795_v12 = vsel %vm1778_vm2, %v1762_v23, %v3704_v32 }
 0x14e   : > { %v989_v37 = vpop.permute.xlu1 %988  ;;  %v1393_v48 = vpop.permute.xlu0 %1392 }
 0x153   : > { %898 = vrot.lane.b32.xlu2 %v3578_v31, %s3163_s14 }
 0x154   : > { %1508 = vrot.lane.b32.xlu1 %v3322_v21, %s3165_s16  ;;  %1502 = vrot.lane.b32.xlu0 %v3821_v52, %s3165_s16  ;;  %v1828_v21 = vsel %vm1811_vm3, %v1795_v12, %v3723_v6  ;;  %v3895_v12 = vld [vmem:[%s3230_s8 + $0x108] sm:$0xff] }
 0x155   : > { %v3833_v45 = vpop.permute.xlu2 %1010  ;;  %v1861_v31 = vsel %vm1844_vm4, %v1828_v21, %v1265_v14 }
 0x156   : > { %v1117_v35 = vpop.permute.xlu1 %1116  ;;  %v1521_v60 = vpop.permute.xlu0 %1520  ;;  %v1894_v32 = vsel %vm1877_vm5, %v1861_v31, %v1393_v48 }
 0x157   : > { %v1927_v20 = vsel %vm1910_vm6, %v1894_v32, %v1521_v60 }
 0x15b   : > { %1636 = vrot.lane.b32.xlu2 %v3346_v27, %s3164_s15  ;;  %v1736_v27 = vsel %vm1712_vm0, %v3850_v54, %v3755_v1 }
 0x15c   : > { %1630 = vrot.lane.b32.xlu1 %v3838_v26, %s3164_s15  ;;  %1140 = vrot.lane.b32.xlu0 %v3602_v44, %s3162_s13  ;;  %v1769_v46 = vsel %vm1745_vm1, %v1736_v27, %v895_v47 }
 0x15d   : > { %v3856_v6 = vpop.permute.xlu2 %1138  ;;  %v1802_v48 = vsel %vm1778_vm2, %v1769_v46, %v3741_v13 }
 0x15e   : > { %v3853_v29 = vpop.permute.xlu1 %754  ;;  %v1649_v24 = vpop.permute.xlu0 %1648  ;;  %v1835_v47 = vsel %vm1811_vm3, %v1802_v48, %v3757_v36  ;;  %v3935_v48 = vld [vmem:[%s3230_s8 + $0x99] sm:$0xff] }
 0x15f   : > { %v1960_v39 = vsel %vm1943_vm7, %v1927_v20, %v1649_v24  ;;  %v3915_v24 = vld [vmem:[%s3230_s8 + $0x98] sm:$0xff] }
 0x160   : > { %3029 = vmatmul.msk.f32.gmra.mxu2 %vm1976_vm8, %v1960_v39 }
 0x163   : > { %1026 = vrot.lane.b32.xlu2 %v3598_v43, %s3159_s10 }
 0x164   : > { %742 = vrot.lane.b32.xlu1 %v3821_v52, %s3160_s11  ;;  %736 = vrot.lane.b32.xlu0 %v3450_v62, %s3160_s11  ;;  %v1868_v62 = vsel %vm1844_vm4, %v1835_v47, %v3773_v51  ;;  %v1719_v51 = vsel %vm1712_vm0, %v3303_v18, %v3793_v59  ;;  %v3912_v59 = vld [vmem:[%s3230_s8 + $0x109] sm:$0xff] }
 0x165   : > { %v3874_v1 = vpop.permute.xlu2 %740  ;;  %v1901_v43 = vsel %vm1877_vm5, %v1868_v62, %v1407_v33  ;;  %v1752_v33 = vsel %vm1745_vm1, %v1719_v51, %v861_v11  ;;  %v3961_v51 = vld [vmem:[%s3230_s8 + $0x9a] sm:$0xff] }
 0x166   : > { %v3870_v14 = vpop.permute.xlu1 %882  ;;  %v1535_v49 = vpop.permute.xlu0 %1534  ;;  %v1785_v31 = vsel %vm1778_vm2, %v1752_v33, %v989_v37 }
 0x167   : > { %v1934_v23 = vsel %vm1910_vm6, %v1901_v43, %v1535_v49  ;;  %v1818_v18 = vsel %vm1811_vm3, %v1785_v31, %v1117_v35  ;;  %v3938_v49 = vld [vmem:[%s3230_s8 + $0x158] sm:$0xff]  ;;  %v3949_v43 = vld [vmem:[%s3230_s8 + $0x10a] sm:$0xff]  ;;  %v1730_v31 = vsel %vm1712_vm0, %v3457_v2, %v3853_v29 }
 0x168   : > { %v1851_v39 = vsel %vm1844_vm4, %v1818_v18, %v3807_v57  ;;  %v1763_v18 = vsel %vm1745_vm1, %v1730_v31, %v3870_v14  ;;  %v4012_v31 = vld [vmem:[%s3230_s8 + $0x120] sm:$0xff] }
 0x169   : > { %v1884_v11 = vsel %vm1877_vm5, %v1851_v39, %v3818_v3 }
 0x16b   : > { %870 = vrot.lane.b32.xlu2 %v3838_v26, %s3163_s14 }
 0x16c   : > { %864 = vrot.lane.b32.xlu1 %v3476_v19, %s3163_s14  ;;  %1268 = vrot.lane.b32.xlu0 %v3616_v53, %s3158_s9 }
 0x16d   : > { %v3890_v36 = vpop.permute.xlu2 %862 }
 0x16e   : > { %v3887_v13 = vpop.permute.xlu1 %768  ;;  %v1663_v19 = vpop.permute.xlu0 %1662 }
 0x16f   : > { %v1967_v60 = vsel %vm1943_vm7, %v1934_v23, %v1663_v19 }
 0x170   : > { %3036 = vmatmul.msk.f32.vlgmr.msra.gmra.mxu3 %vm1976_vm8, %v1967_v60 }
 0x173   : > { %992 = vrot.lane.b32.xlu2 %v3631_v63, %s3159_s10 }
 0x174   : > { %1396 = vrot.lane.b32.xlu1 %v3895_v12, %s3161_s12  ;;  %1154 = vrot.lane.b32.xlu0 %v3635_v61, %s3162_s13 }
 0x175   : > { %v1395_v32 = vpop.permute.xlu2 %1394 }
 0x176   : > { %v3907_v21 = vpop.permute.xlu1 %896  ;;  %v1501_v20 = vpop.permute.xlu0 %1500 }
 0x177   : > { %v1917_v35 = vsel %vm1910_vm6, %v1884_v11, %v1501_v20  ;;  %v3975_v20 = vld [vmem:[%s3230_s8 + $0x15a] sm:$0xff] }
 0x17b   : > { %1524 = vrot.lane.b32.xlu2 %v3912_v59, %s3165_s16 }
 0x17c   : > { %1282 = vrot.lane.b32.xlu1 %v3649_v22, %s3158_s9  ;;  %998 = vrot.lane.b32.xlu0 %v3915_v24, %s3159_s10 }
 0x17d   : > { %v3930_v27 = vpop.permute.xlu2 %1280 }
 0x17e   : > { %v3927_v37 = vpop.permute.xlu1 %734  ;;  %v1629_v57 = vpop.permute.xlu0 %1628 }
 0x17f   : > { %v1950_v46 = vsel %vm1943_vm7, %v1917_v35, %v1629_v57 }
 0x180   : > { %3019 = vmatmul.msk.f32.gmra.mxu0 %vm1976_vm8, %v1950_v46 }
 0x183   : > { %1410 = vrot.lane.b32.xlu2 %v3938_v49, %s3161_s12 }
 0x184   : > { %1126 = vrot.lane.b32.xlu1 %v3935_v48, %s3162_s13  ;;  %1120 = vrot.lane.b32.xlu0 %v3660_v30, %s3162_s13  ;;  %v3958_v30 = vld [vmem:[%s3230_s8 + $0x159] sm:$0xff] }
 0x185   : > { %v3946_v47 = vpop.permute.xlu2 %1124 }
 0x186   : > { %v1267_v3 = vpop.permute.xlu1 %1266  ;;  %v1025_v62 = vpop.permute.xlu0 %1024 }
 0x18b   : > { %1248 = vrot.lane.b32.xlu2 %v3674_v15, %s3158_s9 }
 0x18c   : > { %758 = vrot.lane.b32.xlu1 %v3503_v41, %s3160_s11  ;;  %1652 = vrot.lane.b32.xlu0 %v3949_v43, %s3164_s15 }
 0x18d   : > { %v757_v19 = vpop.permute.xlu2 %756 }
 0x18e   : > { %v1153_v23 = vpop.permute.xlu1 %1152  ;;  %v869_v60 = vpop.permute.xlu0 %868 }
 0x193   : > { %886 = vrot.lane.b32.xlu2 %v3500_v40, %s3163_s14  ;;  %v1796_v40 = vsel %vm1778_vm2, %v1763_v18, %v3833_v45  ;;  %v4015_v18 = vld [vmem:[%s3230_s8 + $0xb2] sm:$0xff] }
 0x194   : > { %1538 = vrot.lane.b32.xlu1 %v3958_v30, %s3165_s16  ;;  %1254 = vrot.lane.b32.xlu0 %v3961_v51, %s3158_s9  ;;  %v1829_v14 = vsel %vm1811_vm3, %v1796_v40, %v3856_v6  ;;  %5026 = vst [vmem:[#allocation3_spill] sm:$0xff] %v4015_v18  ;;  %v1737_v40 = vsel %vm1712_vm0, %v4012_v31, %v3887_v13 }
 0x195   : > { %v1537_v15 = vpop.permute.xlu2 %1536  ;;  %v1862_v11 = vsel %vm1844_vm4, %v1829_v14, %v1267_v3 }
 0x196   : > { %v997_v41 = vpop.permute.xlu1 %996  ;;  %v3969_v33 = vpop.permute.xlu0 %990 }
 0x19b   : > { %1666 = vrot.lane.b32.xlu2 %v3975_v20, %s3164_s15 }
 0x19c   : > { %1382 = vrot.lane.b32.xlu1 %v3689_v55, %s3161_s12  ;;  %1376 = vrot.lane.b32.xlu0 %v3729_v16, %s3161_s12  ;;  %v1895_v55 = vsel %vm1877_vm5, %v1862_v11, %v1395_v32 }
 0x19d   : > { %v1381_v2 = vpop.permute.xlu2 %1380 }
 0x19e   : > { %v3987_v39 = vpop.permute.xlu1 %1118  ;;  %v1523_v29 = vpop.permute.xlu0 %1522 }
 0x19f   : > { %v1928_v45 = vsel %vm1910_vm6, %v1895_v55, %v1523_v29  ;;  %v416_v29 = vld [vmem:[%s3230_s8 + $0xd8] sm:$0xff] }
 0x1a0   : > { %v1731_v55 = vsel %vm1712_vm0, %v416_v29, %v757_v19 }
 0x1a3   : > { %1504 = vrot.lane.b32.xlu2 %v3744_v9, %s3165_s16 }
 0x1a4   : > { %1014 = vrot.lane.b32.xlu1 %v3712_v0, %s3159_s10  ;;  %772 = vrot.lane.b32.xlu0 %v3709_v38, %s3160_s11  ;;  %v4003_v0 = vld [vmem:[%s3230_s8 + $0xb1] sm:$0xff] }
 0x1a5   : > { %v1013_v6 = vpop.permute.xlu2 %1012 }
 0x1a6   : > { %v1651_v35 = vpop.permute.xlu1 %1650  ;;  %v1409_v57 = vpop.permute.xlu0 %1408 }
 0x1a7   : > { %v1961_v46 = vsel %vm1943_vm7, %v1928_v45, %v1651_v35 }
 0x1a8   : > { %3030 = vmatmul.msk.f32.gmra.mxu2 %vm1976_vm8, %v1961_v46 }
 0x1ab   : > { %1142 = vrot.lane.b32.xlu2 %v3747_v17, %s3162_s13 }
 0x1ac   : > { %900 = vrot.lane.b32.xlu1 %v3732_v28, %s3163_s14  ;;  %1510 = vrot.lane.b32.xlu0 %v4003_v0, %s3165_s16  ;;  %v1770_v28 = vsel %vm1745_vm1, %v1737_v40, %v3907_v21  ;;  %v1723_v21 = vsel %vm1712_vm0, %v3631_v63, %v3874_v1  ;;  %v405_v1 = vld [vmem:[%s3230_s8 + $0x50] sm:$0xff] }
 0x1ad   : > { %v899_v32 = vpop.permute.xlu2 %898  ;;  %v1803_v11 = vsel %vm1778_vm2, %v1770_v28, %v1025_v62  ;;  %v1756_v62 = vsel %vm1745_vm1, %v1723_v21, %v869_v60  ;;  %v406_v21 = vld [vmem:[%s3230_s8 + $0x60] sm:$0xff] }
 0x1ae   : > { %v1253_v38 = vpop.permute.xlu1 %1252  ;;  %v1247_v3 = vpop.permute.xlu0 %1246  ;;  %v1836_v35 = vsel %vm1811_vm3, %v1803_v11, %v1153_v23  ;;  %v4094_v11 = vld [vmem:[%s3230_s8 + $0x111] sm:$0xff] }
 0x1b3   : > { %738 = vrot.lane.b32.xlu2 %v3543_v5, %s3160_s11  ;;  %v1869_v5 = vsel %vm1844_vm4, %v1836_v35, %v3930_v27  ;;  %v1789_v27 = vsel %vm1778_vm2, %v1756_v62, %v997_v41  ;;  %v4108_v35 = vld [vmem:[%s3230_s8 + $0x168] sm:$0xff] }
 0x1b4   : > { %1638 = vrot.lane.b32.xlu1 %v4015_v18, %s3164_s15  ;;  %1632 = vrot.lane.b32.xlu0 %v3777_v56, %s3164_s15  ;;  %v1902_v18 = vsel %vm1877_vm5, %v1869_v5, %v1409_v57  ;;  %v2865_v5 = vld [vmem:[%s3230_s8 + $0xa9] sm:$0xff] }
 0x1b5   : > { %v1637_v45 = vpop.permute.xlu2 %1636  ;;  %v1935_v57 = vsel %vm1910_vm6, %v1902_v18, %v1537_v15 }
 0x1b6   : > { %v1375_v14 = vpop.permute.xlu1 %1374  ;;  %v885_v13 = vpop.permute.xlu0 %884 }
 0x1b7   : > { %v1764_v46 = vsel %vm1745_vm1, %v1731_v55, %v885_v13 }
 0x1b8   : > { %v4034_v16 = vsel %vm1778_vm2, %v1764_v46, %v1013_v6  ;;  %v4111_v46 = vld [vmem:[%s3230_s8 + $0x112] sm:$0xff] }
 0x1bb   : > { %1270 = vrot.lane.b32.xlu2 %v3760_v42, %s3158_s9 }
 0x1bc   : > { %1028 = vrot.lane.b32.xlu1 %v3763_v25, %s3159_s10  ;;  %744 = vrot.lane.b32.xlu0 %v3744_v9, %s3160_s11  ;;  %v1822_v9 = vsel %vm1811_vm3, %v1789_v27, %v3946_v47 }
 0x1bd   : > { %v4052_v6 = vpop.permute.xlu2 %1026  ;;  %v1855_v60 = vsel %vm1844_vm4, %v1822_v9, %v1253_v38 }
 0x1be   : > { %v771_v23 = vpop.permute.xlu1 %770  ;;  %v1665_v25 = vpop.permute.xlu0 %1664  ;;  %v1888_v15 = vsel %vm1877_vm5, %v1855_v60, %v1381_v2 }
 0x1bf   : > { %v1738_v19 = vsel %vm1712_vm0, %v3552_v8, %v771_v23  ;;  %v1968_v63 = vsel %vm1943_vm7, %v1935_v57, %v1665_v25  ;;  %v1720_v8 = vsel %vm1712_vm0, %v405_v1, %v3927_v37  ;;  %v2897_v25 = vld [vmem:[%s3230_s8 + $0xaa] sm:$0xff] }
 0x1c0   : > { %v4056_v40 = vsel %vm1745_vm1, %v1738_v19, %v899_v32  ;;  %3037 = vmatmul.msk.f32.gmra.mxu3 %vm1976_vm8, %v1968_v63  ;;  %v4134_v1 = vld [vmem:[%s3230_s8 + $0x169] sm:$0xff] }
 0x1c3   : > { %1156 = vrot.lane.b32.xlu2 %v3780_v58, %s3162_s13 }
 0x1c4   : > { %872 = vrot.lane.b32.xlu1 %v3777_v56, %s3163_s14  ;;  %866 = vrot.lane.b32.xlu0 %v3555_v10, %s3163_s14  ;;  %v1753_v56 = vsel %vm1745_vm1, %v1720_v8, %v3890_v36  ;;  %v4146_v8 = vld [vmem:[%s3230_s8 + $0x16a] sm:$0xff] }
 0x1c5   : > { %v871_v32 = vpop.permute.xlu2 %870  ;;  %v1786_v10 = vsel %vm1778_vm2, %v1753_v56, %v3969_v33 }
 0x1c6   : > { %v1509_v41 = vpop.permute.xlu1 %1508  ;;  %v1503_v18 = vpop.permute.xlu0 %1502  ;;  %v1819_v37 = vsel %vm1811_vm3, %v1786_v10, %v3987_v39 }
 0x1c7   : > { %v1921_v47 = vsel %vm1910_vm6, %v1888_v15, %v1509_v41  ;;  %v1852_v2 = vsel %vm1844_vm4, %v1819_v37, %v1247_v3 }
 0x1c8   : > { %v1954_v38 = vsel %vm1943_vm7, %v1921_v47, %v1637_v45  ;;  %v1885_v29 = vsel %vm1877_vm5, %v1852_v2, %v1375_v14 }
 0x1c9   : > { %3023 = vmatmul.msk.f32.vlgmr.msra.gmra.mxu1 %vm1976_vm8, %v1954_v38  ;;  %v1918_v36 = vsel %vm1910_vm6, %v1885_v29, %v1503_v18  ;;  %v2961_v18 = vld [vmem:[%s3230_s8 + $0xc1] sm:$0xff] }
 0x1cb   : > { %1000 = vrot.lane.b32.xlu2 %v3611_v50, %s3159_s10 }
 0x1cc   : > { %994 = vrot.lane.b32.xlu1 %v3799_v7, %s3159_s10  ;;  %1398 = vrot.lane.b32.xlu0 %v3850_v54, %s3161_s12 }
 0x1cd   : > { %v993_v39 = vpop.permute.xlu2 %992 }
 0x1ce   : > { %v1631_v33 = vpop.permute.xlu1 %1630  ;;  %v1141_v3 = vpop.permute.xlu0 %1140 }
 0x1cf   : > { %v1951_v28 = vsel %vm1943_vm7, %v1918_v36, %v1631_v33  ;;  %v1830_v38 = vsel %vm1811_vm3, %v4034_v16, %v1141_v3  ;;  %v1804_v3 = vsel %vm1778_vm2, %v4056_v40, %v4052_v6 }
 0x1d0   : > { %3020 = vmatmul.msk.f32.gmra.mxu0 %vm1976_vm8, %v1951_v28 }
 0x1d3   : > { %1122 = vrot.lane.b32.xlu2 %v3821_v52, %s3162_s13 }
 0x1d4   : > { %1526 = vrot.lane.b32.xlu1 %v4094_v11, %s3165_s16  ;;  %1284 = vrot.lane.b32.xlu0 %v3810_v4, %s3158_s9 }
 0x1d5   : > { %v1525_v55 = vpop.permute.xlu2 %1524 }
 0x1d6   : > { %v743_v50 = vpop.permute.xlu1 %742  ;;  %v737_v45 = vpop.permute.xlu0 %736 }
 0x1d7   : > { %v1724_v14 = vsel %vm1712_vm0, %v3799_v7, %v743_v50  ;;  %v1721_v7 = vsel %vm1712_vm0, %v406_v21, %v737_v45 }
 0x1d8   : > { %v4105_v13 = vsel %vm1745_vm1, %v1724_v14, %v871_v32 }
 0x1db   : > { %1654 = vrot.lane.b32.xlu2 %v4111_v46, %s3164_s15 }
 0x1dc   : > { %1412 = vrot.lane.b32.xlu1 %v4108_v35, %s3161_s12  ;;  %1128 = vrot.lane.b32.xlu0 %v2865_v5, %s3162_s13  ;;  %v2993_v5 = vld [vmem:[%s3230_s8 + $0xc2] sm:$0xff] }
 0x1dd   : > { %v1411_v23 = vpop.permute.xlu2 %1410 }
 0x1de   : > { %v865_v52 = vpop.permute.xlu1 %864  ;;  %v1269_v27 = vpop.permute.xlu0 %1268 }
 0x1df   : > { %v1754_v62 = vsel %vm1745_vm1, %v1721_v7, %v865_v52  ;;  %v1863_v56 = vsel %vm1844_vm4, %v1830_v38, %v1269_v27 }
 0x1e0   : > { %v4123_v19 = vsel %vm1778_vm2, %v1754_v62, %v993_v39  ;;  %v2834_v62 = vld [vmem:[%s3230_s8 + $0xb0] sm:$0xff] }
 0x1e3   : > { %1256 = vrot.lane.b32.xlu2 %v2897_v25, %s3158_s9 }
 0x1e4   : > { %1250 = vrot.lane.b32.xlu1 %v3838_v26, %s3158_s9  ;;  %760 = vrot.lane.b32.xlu0 %v3602_v44, %s3160_s11 }
 0x1e5   : > { %v4131_v63 = vpop.permute.xlu2 %1248 }
 0x1e6   : > { %v1397_v57 = vpop.permute.xlu1 %1396  ;;  %v1155_v9 = vpop.permute.xlu0 %1154 }
 0x1e7   : > { %v1896_v10 = vsel %vm1877_vm5, %v1863_v56, %v1397_v57 }
 0x1e8   : > { %v1929_v16 = vsel %vm1910_vm6, %v1896_v10, %v1525_v55  ;;  %v4257_v10 = vld [vmem:[%s3230_s8 + $0x122] sm:$0xff] }
 0x1eb   : > { %1378 = vrot.lane.b32.xlu2 %v3915_v24, %s3161_s12 }
 0x1ec   : > { %888 = vrot.lane.b32.xlu1 %v3616_v53, %s3163_s14  ;;  %1540 = vrot.lane.b32.xlu0 %v4134_v1, %s3165_s16  ;;  %v2929_v53 = vld [vmem:[%s3230_s8 + $0xc0] sm:$0xff] }
 0x1ed   : > { %v887_v60 = vpop.permute.xlu2 %886 }
 0x1ee   : > { %v1283_v26 = vpop.permute.xlu1 %1282  ;;  %v4143_v44 = vpop.permute.xlu0 %998 }
 0x1f3   : > { %v4154_v41 = vpop.f32.mrf.mxu3  ;;  %774 = vrot.lane.b32.xlu2 %v3635_v61, %s3160_s11  ;;  %v417_v61 = vld [vmem:[%s3230_s8 + $0xe0] sm:$0xff] }
 0x1f4   : > { %1668 = vrot.lane.b32.xlu1 %v4146_v8, %s3164_s15  ;;  %2161 = vst [vmem:[%s4151_s22 + $0xb8] sm:$0xff] %v4154_v41  ;;  %1384 = vrot.lane.b32.xlu0 %v2929_v53, %s3161_s12  ;;  %v4236_v53 = vld [vmem:[%s3230_s8 + $0x121] sm:$0xff] }
 0x1f5   : > { %v1667_v47 = vpop.permute.xlu2 %1666 }
 0x1f6   : > { %v1127_v15 = vpop.permute.xlu1 %1126  ;;  %v1121_v32 = vpop.permute.xlu0 %1120 }
 0x1fb   : > { %1512 = vrot.lane.b32.xlu2 %v2961_v18, %s3165_s16 }
 0x1fc   : > { %1506 = vrot.lane.b32.xlu1 %v3935_v48, %s3165_s16  ;;  %1016 = vrot.lane.b32.xlu0 %v3895_v12, %s3159_s10  ;;  %v1837_v12 = vsel %vm1811_vm3, %v1804_v3, %v1155_v9  ;;  %v1820_v9 = vsel %vm1811_vm3, %v4123_v19, %v1121_v32 }
 0x1fd   : > { %v1505_v29 = vpop.permute.xlu2 %1504  ;;  %v1870_v28 = vsel %vm1844_vm4, %v1837_v12, %v1283_v26  ;;  %v4230_v26 = vld [vmem:[%s3230_s8 + $0x170] sm:$0xff] }
 0x1fe   : > { %v759_v37 = vpop.permute.xlu1 %758  ;;  %v1653_v36 = vpop.permute.xlu0 %1652  ;;  %v1903_v14 = vsel %vm1877_vm5, %v1870_v28, %v1411_v23 }
 0x1ff   : > { %v1732_v2 = vsel %vm1712_vm0, %v417_v61, %v759_v37  ;;  %v1962_v33 = vsel %vm1943_vm7, %v1929_v16, %v1653_v36  ;;  %v5027_v61 = vld [vmem:[#allocation3_spill] sm:$0xff]  ;;  %v4269_v16 = vld [vmem:[%s3230_s8 + $0x171] sm:$0xff] }
 0x200   : > { %v4178_v39 = vsel %vm1745_vm1, %v1732_v2, %v887_v60  ;;  %3031 = vmatmul.msk.f32.gmra.mxu2 %vm1976_vm8, %v1962_v33  ;;  %v1790_v60 = vsel %vm1778_vm2, %v4105_v13, %v4143_v44  ;;  %v2930_v36 = vld [vmem:[%s3230_s8 + $0xc8] sm:$0xff] }
 0x203   : > { %1634 = vrot.lane.b32.xlu2 %v3961_v51, %s3164_s15 }
 0x204   : > { %1144 = vrot.lane.b32.xlu1 %v3912_v59, %s3162_s13  ;;  %902 = vrot.lane.b32.xlu0 %v3649_v22, %s3163_s14 }
 0x205   : > { %v4194_v40 = vpop.permute.xlu2 %1142 }
 0x206   : > { %v1539_v50 = vpop.permute.xlu1 %1538  ;;  %v1255_v55 = vpop.permute.xlu0 %1254 }
 0x207   : > { %v1936_v6 = vsel %vm1910_vm6, %v1903_v14, %v1539_v50 }
 0x208   : > { %v1969_v45 = vsel %vm1943_vm7, %v1936_v6, %v1667_v47  ;;  %v1853_v47 = vsel %vm1844_vm4, %v1820_v9, %v4131_v63  ;;  %v4283_v6 = vld [vmem:[%s3230_s8 + $0x172] sm:$0xff] }
 0x209   : > { %3038 = vmatmul.msk.f32.gmra.mxu3 %vm1976_vm8, %v1969_v45 }
 0x20b   : > { %1030 = vrot.lane.b32.xlu2 %v3938_v49, %s3159_s10 }
 0x20c   : > { %746 = vrot.lane.b32.xlu1 %v3935_v48, %s3160_s11  ;;  %1640 = vrot.lane.b32.xlu0 %v2993_v5, %s3164_s15 }
 0x20d   : > { %v4204_v21 = vpop.permute.xlu2 %738 }
 0x20e   : > { %v1383_v22 = vpop.permute.xlu1 %1382  ;;  %v1377_v7 = vpop.permute.xlu0 %1376 }
 0x20f   : > { %v1886_v38 = vsel %vm1877_vm5, %v1853_v47, %v1377_v7  ;;  %v2962_v7 = vld [vmem:[%s3230_s8 + $0xc9] sm:$0xff] }
 0x210   : > { %v1919_v32 = vsel %vm1910_vm6, %v1886_v38, %v1505_v29  ;;  %v3002_v47 = vld [vmem:[%s3230_s8 + $0x12a] sm:$0xff] }
 0x213   : > { %1158 = vrot.lane.b32.xlu2 %v3958_v30, %s3162_s13 }
 0x214   : > { %874 = vrot.lane.b32.xlu1 %v3961_v51, %s3163_s14  ;;  %1272 = vrot.lane.b32.xlu0 %v3949_v43, %s3158_s9 }
 0x215   : > { %v4212_v52 = vpop.permute.xlu2 %1270 }
 0x216   : > { %v1015_v48 = vpop.permute.xlu1 %1014  ;;  %v773_v49 = vpop.permute.xlu0 %772 }
 0x217   : > { %v1739_v51 = vsel %vm1712_vm0, %v3693_v34, %v773_v49  ;;  %v1823_v34 = vsel %vm1811_vm3, %v1790_v60, %v1127_v15 }
 0x218   : > { %v1856_v18 = vsel %vm1844_vm4, %v1823_v34, %v1255_v55  ;;  %v1798_v55 = vsel %vm1778_vm2, %v4178_v39, %v1015_v48  ;;  %v4330_v34 = vld [vmem:[%s3230_s8 + $0x180] sm:$0xff] }
 0x219   : > { %v1889_v13 = vsel %vm1877_vm5, %v1856_v18, %v1383_v22  ;;  %v1831_v22 = vsel %vm1811_vm3, %v1798_v55, %v4194_v40  ;;  %v2970_v18 = vld [vmem:[%s3230_s8 + $0x129] sm:$0xff] }
 0x21b   : > { %1286 = vrot.lane.b32.xlu2 %v3975_v20, %s3158_s9 }
 0x21c   : > { %1002 = vrot.lane.b32.xlu1 %v2834_v62, %s3159_s10  ;;  %1400 = vrot.lane.b32.xlu0 %v4012_v31, %s3161_s12 }
 0x21d   : > { %v4225_v25 = vpop.permute.xlu2 %1156 }
 0x21e   : > { %v901_v23 = vpop.permute.xlu1 %900  ;;  %v1511_v57 = vpop.permute.xlu0 %1510 }
 0x21f   : > { %v4223_v27 = vsel %vm1745_vm1, %v1739_v51, %v901_v23  ;;  %v1922_v19 = vsel %vm1910_vm6, %v1889_v13, %v1511_v57  ;;  %v2938_v57 = vld [vmem:[%s3230_s8 + $0x128] sm:$0xff] }
 0x223   : > { %1414 = vrot.lane.b32.xlu2 %v4230_v26, %s3161_s12 }
 0x224   : > { %1130 = vrot.lane.b32.xlu1 %v4003_v0, %s3162_s13  ;;  %1528 = vrot.lane.b32.xlu0 %v4236_v53, %s3165_s16 }
 0x225   : > { %v1001_v44 = vpop.permute.xlu2 %1000 }
 0x226   : > { %v1639_v63 = vpop.permute.xlu1 %1638  ;;  %v1633_v15 = vpop.permute.xlu0 %1632 }
 0x227   : > { %v1955_v56 = vsel %vm1943_vm7, %v1922_v19, %v1639_v63  ;;  %v1952_v0 = vsel %vm1943_vm7, %v1919_v32, %v1633_v15  ;;  %v407_v15 = vld [vmem:[%s3230_s8 + $0x68] sm:$0xff] }
 0x228   : > { %3024 = vmatmul.msk.f32.gmra.mxu1 %vm1976_vm8, %v1955_v56  ;;  %3021 = vmatmul.msk.f32.gmra.mxu0 %vm1976_vm8, %v1952_v0  ;;  %v1722_v0 = vsel %vm1712_vm0, %v407_v15, %v4204_v21 }
 0x22b   : > { %1258 = vrot.lane.b32.xlu2 %v5027_v61, %s3158_s9 }
 0x22c   : > { %762 = vrot.lane.b32.xlu1 %v3747_v17, %s3160_s11  ;;  %1656 = vrot.lane.b32.xlu0 %v4257_v10, %s3164_s15  ;;  %v5028_v17 = vld [vmem:[#allocation2_spill] sm:$0xff] }
 0x22d   : > { %v4265_v2 = vpop.permute.xlu2 %1122 }
 0x22e   : > { %v1029_v37 = vpop.permute.xlu1 %1028  ;;  %v745_v29 = vpop.permute.xlu0 %744 }
 0x22f   : > { %v1725_v33 = vsel %vm1712_vm0, %v5028_v17, %v745_v29  ;;  %v1805_v63 = vsel %vm1778_vm2, %v4223_v27, %v1029_v37 }
 0x230   : > { %v1838_v32 = vsel %vm1811_vm3, %v1805_v63, %v4225_v25 }
 0x233   : > { %1386 = vrot.lane.b32.xlu2 %v2930_v36, %s3161_s12 }
 0x234   : > { %890 = vrot.lane.b32.xlu1 %v3760_v42, %s3163_s14  ;;  %1542 = vrot.lane.b32.xlu0 %v4269_v16, %s3165_s16 }
 0x235   : > { %v1655_v28 = vpop.permute.xlu2 %1654 }
 0x236   : > { %v873_v3 = vpop.permute.xlu1 %872  ;;  %v867_v50 = vpop.permute.xlu0 %866 }
 0x237   : > { %v1758_v12 = vsel %vm1745_vm1, %v1725_v33, %v873_v3  ;;  %v1755_v61 = vsel %vm1745_vm1, %v1722_v0, %v867_v50  ;;  %v3009_v33 = vld [vmem:[%s3230_s8 + $0x182] sm:$0xff] }
 0x238   : > { %v4280_v14 = vsel %vm1778_vm2, %v1758_v12, %v1001_v44  ;;  %v4343_v44 = vld [vmem:[%s3230_s8 + $0x181] sm:$0xff] }
 0x239   : > { %v425_v0 = vld [vmem:[%s3230_s8 + $0x140] sm:$0xff] }
 0x23b   : > { %1018 = vrot.lane.b32.xlu2 %v3850_v54, %s3159_s10 }
 0x23c   : > { %776 = vrot.lane.b32.xlu1 %v3780_v58, %s3160_s11  ;;  %1670 = vrot.lane.b32.xlu0 %v4283_v6, %s3164_s15  ;;  %v1864_v58 = vsel %vm1844_vm4, %v1831_v22, %v4212_v52  ;;  %v2939_v22 = vld [vmem:[%s3230_s8 + $0x138] sm:$0xff] }
 0x23d   : > { %v4293_v45 = vpop.permute.xlu2 %1256 }
 0x23e   : > { %v995_v42 = vpop.permute.xlu1 %994  ;;  %v1399_v5 = vpop.permute.xlu0 %1398 }
 0x23f   : > { %v1897_v54 = vsel %vm1877_vm5, %v1864_v58, %v1399_v5  ;;  %v1788_v29 = vsel %vm1778_vm2, %v1755_v61, %v995_v42  ;;  %v3011_v61 = vld [vmem:[%s3230_s8 + $0x19a] sm:$0xff] }
 0x240   : > { %v1821_v21 = vsel %vm1811_vm3, %v1788_v29, %v4265_v2 }
 0x243   : > { %v4298_v49 = vpop.f32.mrf.mxu3  ;;  %1146 = vrot.lane.b32.xlu2 %v4094_v11, %s3162_s13  ;;  %v2994_v11 = vld [vmem:[%s3230_s8 + $0xca] sm:$0xff] }
 0x244   : > { %904 = vrot.lane.b32.xlu1 %v3810_v4, %s3163_s14  ;;  %2162 = vst [vmem:[%s4151_s22 + $0xc0] sm:$0xff] %v4298_v49  ;;  %1514 = vrot.lane.b32.xlu0 %v2962_v7, %s3165_s16 }
 0x245   : > { %v1379_v48 = vpop.permute.xlu2 %1378 }
 0x246   : > { %v1527_v39 = vpop.permute.xlu1 %1526  ;;  %v1285_v62 = vpop.permute.xlu0 %1284 }
 0x247   : > { %v1930_v40 = vsel %vm1910_vm6, %v1897_v54, %v1527_v39  ;;  %v1871_v56 = vsel %vm1844_vm4, %v1838_v32, %v1285_v62  ;;  %v2971_v39 = vld [vmem:[%s3230_s8 + $0x139] sm:$0xff] }
 0x248   : > { %v1963_v4 = vsel %vm1943_vm7, %v1930_v40, %v1655_v28  ;;  %v2946_v40 = vld [vmem:[%s3230_s8 + $0x188] sm:$0xff] }
 0x249   : > { %3032 = vmatmul.msk.f32.gmra.mxu2 %vm1976_vm8, %v1963_v4  ;;  %v2978_v4 = vld [vmem:[%s3230_s8 + $0x189] sm:$0xff] }
 0x24b   : > { %1274 = vrot.lane.b32.xlu2 %v4111_v46, %s3158_s9 }
 0x24c   : > { %1032 = vrot.lane.b32.xlu1 %v4108_v35, %s3159_s10  ;;  %1642 = vrot.lane.b32.xlu0 %v2994_v11, %s3164_s15  ;;  %v3010_v11 = vld [vmem:[%s3230_s8 + $0x18a] sm:$0xff] }
 0x24d   : > { %v4319_v51 = vpop.permute.xlu2 %774 }
 0x24e   : > { %v1413_v52 = vpop.permute.xlu1 %1412  ;;  %v1129_v23 = vpop.permute.xlu0 %1128 }
 0x24f   : > { %v1904_v27 = vsel %vm1877_vm5, %v1871_v56, %v1413_v52  ;;  %v1824_v5 = vsel %vm1811_vm3, %v4280_v14, %v1129_v23  ;;  %v3003_v52 = vld [vmem:[%s3230_s8 + $0x13a] sm:$0xff] }
 0x250   : > { %v1857_v7 = vsel %vm1844_vm4, %v1824_v5, %v4293_v45 }
 0x253   : > { %1288 = vrot.lane.b32.xlu2 %v4146_v8, %s3158_s9 }
 0x254   : > { %1402 = vrot.lane.b32.xlu1 %v2938_v57, %s3161_s12  ;;  %1160 = vrot.lane.b32.xlu0 %v4134_v1, %s3162_s13 }
 0x255   : > { %v1513_v60 = vpop.permute.xlu2 %1512 }
 0x256   : > { %v1251_v9 = vpop.permute.xlu1 %1250  ;;  %v4327_v46 = vpop.permute.xlu0 %760 }
 0x25b   : > { %1658 = vrot.lane.b32.xlu2 %v3002_v47, %s3164_s15 }
 0x25c   : > { %1416 = vrot.lane.b32.xlu1 %v4330_v34, %s3161_s12  ;;  %1530 = vrot.lane.b32.xlu0 %v2970_v18, %s3165_s16 }
 0x25d   : > { %v1635_v13 = vpop.permute.xlu2 %1634 }
 0x25e   : > { %v4338_v38 = vpop.permute.xlu1 %888  ;;  %v1541_v19 = vpop.permute.xlu0 %1540 }
 0x25f   : > { %v1937_v25 = vsel %vm1910_vm6, %v1904_v27, %v1541_v19  ;;  %v2947_v19 = vld [vmem:[%s3230_s8 + $0x198] sm:$0xff] }
 0x263   : > { %892 = vrot.lane.b32.xlu2 %v3949_v43, %s3163_s14 }
 0x264   : > { %1544 = vrot.lane.b32.xlu1 %v4343_v44, %s3165_s16  ;;  %764 = vrot.lane.b32.xlu0 %v3912_v59, %s3160_s11  ;;  %v1854_v59 = vsel %vm1844_vm4, %v1821_v21, %v1251_v9 }
 0x265   : > { %v4361_v36 = vpop.permute.xlu2 %1030  ;;  %v1887_v12 = vsel %vm1877_vm5, %v1854_v59, %v1379_v48 }
 0x266   : > { %v1669_v37 = vpop.permute.xlu1 %1668  ;;  %v1385_v17 = vpop.permute.xlu0 %1384 }
 0x267   : > { %v1970_v43 = vsel %vm1943_vm7, %v1937_v25, %v1669_v37  ;;  %v2979_v25 = vld [vmem:[%s3230_s8 + $0x199] sm:$0xff]  ;;  %v1740_v37 = vsel %vm1712_vm0, %v425_v0, %v4319_v51 }
 0x268   : > { %3039 = vmatmul.msk.f32.gmra.mxu3 %vm1976_vm8, %v1970_v43 }
 0x26b   : > { %1020 = vrot.lane.b32.xlu2 %v4012_v31, %s3159_s10 }
 0x26c   : > { %778 = vrot.lane.b32.xlu1 %v3958_v30, %s3160_s11  ;;  %1672 = vrot.lane.b32.xlu0 %v3009_v33, %s3164_s15 }
 0x26d   : > { %v4376_v50 = vpop.permute.xlu2 %1158 }
 0x26e   : > { %v1507_v3 = vpop.permute.xlu1 %1506  ;;  %v1017_v2 = vpop.permute.xlu0 %1016 }
 0x26f   : > { %v1920_v28 = vsel %vm1910_vm6, %v1887_v12, %v1507_v3 }
 0x270   : > { %v1953_v42 = vsel %vm1943_vm7, %v1920_v28, %v1635_v13 }
 0x271   : > { %3022 = vmatmul.msk.f32.gmra.mxu0 %vm1976_vm8, %v1953_v42 }
 0x273   : > { %1034 = vrot.lane.b32.xlu2 %v4230_v26, %s3159_s10 }
 0x274   : > { %1148 = vrot.lane.b32.xlu1 %v4236_v53, %s3162_s13  ;;  %906 = vrot.lane.b32.xlu0 %v3975_v20, %s3163_s14  ;;  %v1890_v53 = vsel %vm1877_vm5, %v1857_v7, %v1385_v17  ;;  %v3012_v7 = vld [vmem:[%s3230_s8 + $0x1a2] sm:$0xff] }
 0x275   : > { %v4386_v31 = vpop.permute.xlu2 %1286  ;;  %v1923_v54 = vsel %vm1910_vm6, %v1890_v53, %v1513_v60  ;;  %v418_v60 = vld [vmem:[%s3230_s8 + $0xf0] sm:$0xff] }
 0x276   : > { %v1145_v30 = vpop.permute.xlu1 %1144  ;;  %v903_v55 = vpop.permute.xlu0 %902  ;;  %v1733_v13 = vsel %vm1712_vm0, %v418_v60, %v4327_v46 }
 0x277   : > { %v1766_v63 = vsel %vm1745_vm1, %v1733_v13, %v4338_v38  ;;  %v1773_v29 = vsel %vm1745_vm1, %v1740_v37, %v903_v55  ;;  %v426_v13 = vld [vmem:[%s3230_s8 + $0x150] sm:$0xff] }
 0x278   : > { %v1806_v43 = vsel %vm1778_vm2, %v1773_v29, %v4361_v36 }
 0x279   : > { %v1839_v51 = vsel %vm1811_vm3, %v1806_v43, %v4376_v50  ;;  %v2948_v50 = vld [vmem:[%s3230_s8 + $0x1a0] sm:$0xff] }
 0x27b   : > { %1404 = vrot.lane.b32.xlu2 %v2939_v22, %s3161_s12 }
 0x27c   : > { %1162 = vrot.lane.b32.xlu1 %v4269_v16, %s3162_s13  ;;  %1276 = vrot.lane.b32.xlu0 %v4257_v10, %s3158_s9 }
 0x27d   : > { %v1415_v14 = vpop.permute.xlu2 %1414 }
 0x27e   : > { %v4399_v20 = vpop.permute.xlu1 %746  ;;  %v1641_v58 = vpop.permute.xlu0 %1640 }
 0x27f   : > { %v1956_v45 = vsel %vm1943_vm7, %v1923_v54, %v1641_v58  ;;  %v1726_v42 = vsel %vm1712_vm0, %v3915_v24, %v4399_v20 }
 0x280   : > { %3025 = vmatmul.msk.f32.gmra.mxu1 %vm1976_vm8, %v1956_v45 }
 0x283   : > { %1418 = vrot.lane.b32.xlu2 %v2946_v40, %s3161_s12 }
 0x284   : > { %1532 = vrot.lane.b32.xlu1 %v2971_v39, %s3165_s16  ;;  %1290 = vrot.lane.b32.xlu0 %v4283_v6, %s3158_s9 }
 0x285   : > { %v4412_v62 = vpop.permute.xlu2 %1258 }
 0x286   : > { %v4410_v10 = vpop.permute.xlu1 %874  ;;  %v1273_v48 = vpop.permute.xlu0 %1272 }
 0x28b   : > { %1674 = vrot.lane.b32.xlu2 %v3010_v11, %s3164_s15 }
 0x28c   : > { %1546 = vrot.lane.b32.xlu1 %v2978_v4, %s3165_s16  ;;  %1660 = vrot.lane.b32.xlu0 %v3003_v52, %s3164_s15 }
 0x28d   : > { %v4420_v9 = vpop.permute.xlu2 %1386 }
 0x28e   : > { %v1003_v23 = vpop.permute.xlu1 %1002  ;;  %v1401_v57 = vpop.permute.xlu0 %1400 }
 0x293   : > { %1036 = vrot.lane.b32.xlu2 %v4330_v34, %s3159_s10  ;;  %v1799_v34 = vsel %vm1778_vm2, %v1766_v63, %v1017_v2  ;;  %v2980_v2 = vld [vmem:[%s3230_s8 + $0x1a1] sm:$0xff] }
 0x294   : > { %908 = vrot.lane.b32.xlu1 %v4146_v8, %s3163_s14  ;;  %780 = vrot.lane.b32.xlu0 %v4134_v1, %s3160_s11  ;;  %v1832_v15 = vsel %vm1811_vm3, %v1799_v34, %v1145_v30 }
 0x295   : > { %v4434_v8 = vpop.permute.xlu2 %1018  ;;  %v1865_v1 = vsel %vm1844_vm4, %v1832_v15, %v1273_v48 }
 0x296   : > { %v1131_v47 = vpop.permute.xlu1 %1130  ;;  %v1529_v18 = vpop.permute.xlu0 %1528  ;;  %v1898_v46 = vsel %vm1877_vm5, %v1865_v1, %v1401_v57 }
 0x297   : > { %v1931_v38 = vsel %vm1910_vm6, %v1898_v46, %v1529_v18 }
 0x29b   : > { %1420 = vrot.lane.b32.xlu2 %v2947_v19, %s3161_s12 }
 0x29c   : > { %1292 = vrot.lane.b32.xlu1 %v3009_v33, %s3158_s9  ;;  %1164 = vrot.lane.b32.xlu0 %v4343_v44, %s3162_s13  ;;  %v1872_v33 = vsel %vm1844_vm4, %v1839_v51, %v4386_v31  ;;  %v427_v51 = vld [vmem:[%s3230_s8 + $0x158] sm:$0xff] }
 0x29d   : > { %v1147_v17 = vpop.permute.xlu2 %1146 }
 0x29e   : > { %v763_v32 = vpop.permute.xlu1 %762  ;;  %v1657_v56 = vpop.permute.xlu0 %1656 }
 0x29f   : > { %v1964_v27 = vsel %vm1943_vm7, %v1931_v38, %v1657_v56 }
 0x2a0   : > { %3033 = vmatmul.msk.f32.gmra.mxu2 %vm1976_vm8, %v1964_v27 }
 0x2a3   : > { %782 = vrot.lane.b32.xlu2 %v4269_v16, %s3160_s11  ;;  %v1905_v16 = vsel %vm1877_vm5, %v1872_v33, %v1415_v14  ;;  %v419_v14 = vld [vmem:[%s3230_s8 + $0xf8] sm:$0xff] }
 0x2a4   : > { %1676 = vrot.lane.b32.xlu1 %v3011_v61, %s3164_s15  ;;  %1548 = vrot.lane.b32.xlu0 %v2979_v25, %s3165_s16 }
 0x2a5   : > { %v1275_v59 = vpop.permute.xlu2 %1274 }
 0x2a6   : > { %v891_v44 = vpop.permute.xlu1 %890  ;;  %v1543_v21 = vpop.permute.xlu0 %1542 }
 0x2a7   : > { %v1938_v36 = vsel %vm1910_vm6, %v1905_v16, %v1543_v21  ;;  %v420_v21 = vld [vmem:[%s3230_s8 + $0x108] sm:$0xff] }
 0x2ab   : > { %1166 = vrot.lane.b32.xlu2 %v2978_v4, %s3162_s13 }
 0x2ac   : > { %1038 = vrot.lane.b32.xlu1 %v2946_v40, %s3159_s10  ;;  %910 = vrot.lane.b32.xlu0 %v4283_v6, %s3163_s14  ;;  %v1759_v6 = vsel %vm1745_vm1, %v1726_v42, %v4410_v10  ;;  %v1734_v40 = vsel %vm1712_vm0, %v419_v14, %v763_v32 }
 0x2ad   : > { %v1289_v31 = vpop.permute.xlu2 %1288  ;;  %v1792_v55 = vsel %vm1778_vm2, %v1759_v6, %v1003_v23  ;;  %v1767_v10 = vsel %vm1745_vm1, %v1734_v40, %v891_v44 }
 0x2ae   : > { %v777_v3 = vpop.permute.xlu1 %776  ;;  %v1671_v12 = vpop.permute.xlu0 %1670  ;;  %v1825_v22 = vsel %vm1811_vm3, %v1792_v55, %v1131_v47  ;;  %v1800_v4 = vsel %vm1778_vm2, %v1767_v10, %v4434_v8 }
 0x2af   : > { %v1971_v28 = vsel %vm1943_vm7, %v1938_v36, %v1671_v12  ;;  %v1858_v24 = vsel %vm1844_vm4, %v1825_v22, %v4412_v62  ;;  %v1833_v52 = vsel %vm1811_vm3, %v1800_v4, %v1147_v17  ;;  %v1741_v63 = vsel %vm1712_vm0, %v426_v13, %v777_v3  ;;  %v4543_v13 = vpop.f32.mrf.mxu0 }
 0x2b0   : > { %3040 = vmatmul.msk.f32.gmra.mxu3 %vm1976_vm8, %v1971_v28  ;;  %v1891_v53 = vsel %vm1877_vm5, %v1858_v24, %v4420_v9  ;;  %v1866_v23 = vsel %vm1844_vm4, %v1833_v52, %v1275_v59 }
 0x2b3   : > { %1550 = vrot.lane.b32.xlu2 %v2980_v2, %s3165_s16 }
 0x2b4   : > { %1422 = vrot.lane.b32.xlu1 %v2948_v50, %s3161_s12  ;;  %1294 = vrot.lane.b32.xlu0 %v3010_v11, %s3158_s9 }
 0x2b5   : > { %v1659_v39 = vpop.permute.xlu2 %1658 }
 0x2b6   : > { %v905_v30 = vpop.permute.xlu1 %904  ;;  %v1515_v5 = vpop.permute.xlu0 %1514 }
 0x2b7   : > { %v1924_v58 = vsel %vm1910_vm6, %v1891_v53, %v1515_v5  ;;  %v1774_v15 = vsel %vm1745_vm1, %v1741_v63, %v905_v30 }
 0x2bc   : > { %1678 = vrot.lane.b32.xlu0 %v3012_v7, %s3164_s15 }
 0x2bd   : > { %v893_v11 = vpop.permute.xlu2 %892 }
 0x2be   : > { %v1033_v20 = vpop.permute.xlu1 %1032  ;;  %v1643_v54 = vpop.permute.xlu0 %1642 }
 0x2bf   : > { %v1957_v45 = vsel %vm1943_vm7, %v1924_v58, %v1643_v54  ;;  %v1807_v1 = vsel %vm1778_vm2, %v1774_v15, %v1033_v20 }
 0x2c0   : > { %3026 = vmatmul.msk.f32.gmra.mxu1 %vm1976_vm8, %v1957_v45 }
 0x2c5   : > { %v1021_v19 = vpop.permute.xlu2 %1020 }
 0x2c6   : > { %v1403_v48 = vpop.permute.xlu1 %1402  ;;  %v1161_v62 = vpop.permute.xlu0 %1160 }
 0x2c7   : > { %v1899_v9 = vsel %vm1877_vm5, %v1866_v23, %v1403_v48  ;;  %v1840_v46 = vsel %vm1811_vm3, %v1807_v1, %v1161_v62 }
 0x2c8   : > { %v1873_v38 = vsel %vm1844_vm4, %v1840_v46, %v1289_v31  ;;  %v4549_v46 = vpop.f32.mrf.mxu0 }
 0x2cd   : > { %v1035_v32 = vpop.permute.xlu2 %1034 }
 0x2ce   : > { %v1417_v57 = vpop.permute.xlu1 %1416  ;;  %v1531_v60 = vpop.permute.xlu0 %1530 }
 0x2cf   : > { %v1932_v47 = vsel %vm1910_vm6, %v1899_v9, %v1531_v60  ;;  %v1906_v56 = vsel %vm1877_vm5, %v1873_v38, %v1417_v57 }
 0x2d0   : > { %v1965_v18 = vsel %vm1943_vm7, %v1932_v47, %v1659_v39 }
 0x2d1   : > { %3034 = vmatmul.msk.f32.gmra.mxu2 %vm1976_vm8, %v1965_v18 }
 0x2d5   : > { %v1405_v29 = vpop.permute.xlu2 %1404 }
 0x2d6   : > { %v1545_v8 = vpop.permute.xlu1 %1544  ;;  %v765_v34 = vpop.permute.xlu0 %764 }
 0x2d7   : > { %v1939_v27 = vsel %vm1910_vm6, %v1906_v56, %v1545_v8  ;;  %v1735_v16 = vsel %vm1712_vm0, %v420_v21, %v765_v34 }
 0x2d8   : > { %v1768_v3 = vsel %vm1745_vm1, %v1735_v16, %v893_v11  ;;  %v2170_v16 = vadd.f32 %v4549_v46, %v4543_v13 }
 0x2d9   : > { %v1801_v50 = vsel %vm1778_vm2, %v1768_v3, %v1021_v19  ;;  %v4575_v3 = vpop.f32.mrf.mxu1 }
 0x2dd   : > { %v1419_v33 = vpop.permute.xlu2 %1418 }
 0x2de   : > { %v779_v0 = vpop.permute.xlu1 %778  ;;  %v1673_v61 = vpop.permute.xlu0 %1672 }
 0x2df   : > { %v1972_v25 = vsel %vm1943_vm7, %v1939_v27, %v1673_v61  ;;  %v1742_v59 = vsel %vm1712_vm0, %v427_v51, %v779_v0  ;;  %v4567_v51 = vpop.f32.mrf.mxu2 }
 0x2e0   : > { %3041 = vmatmul.msk.f32.gmra.mxu3 %vm1976_vm8, %v1972_v25  ;;  %v4554_v25 = vpop.f32.mrf.mxu0 }
 0x2e5   : > { %v1675_v30 = vpop.permute.xlu2 %1674 }
 0x2e6   : > { %v1149_v37 = vpop.permute.xlu1 %1148  ;;  %v907_v17 = vpop.permute.xlu0 %906 }
 0x2e7   : > { %v1775_v36 = vsel %vm1745_vm1, %v1742_v59, %v907_v17  ;;  %v1834_v42 = vsel %vm1811_vm3, %v1801_v50, %v1149_v37  ;;  %v4573_v59 = vpop.f32.mrf.mxu2 }
 0x2e8   : > { %v1808_v2 = vsel %vm1778_vm2, %v1775_v36, %v1035_v32  ;;  %v4559_v17 = vpop.f32.mrf.mxu0  ;;  %v2171_v36 = vadd.f32 %v2170_v16, %v4554_v25 }
 0x2ed   : > { %v1037_v54 = vpop.permute.xlu2 %1036 }
 0x2ee   : > { %v1163_v44 = vpop.permute.xlu1 %1162  ;;  %v1277_v43 = vpop.permute.xlu0 %1276 }
 0x2ef   : > { %v1841_v6 = vsel %vm1811_vm3, %v1808_v2, %v1163_v44  ;;  %v1867_v31 = vsel %vm1844_vm4, %v1834_v42, %v1277_v43  ;;  %v4583_v42 = vpop.f32.mrf.mxu2 }
 0x2f0   : > { %v1900_v5 = vsel %vm1877_vm5, %v1867_v31, %v1405_v29  ;;  %v4561_v44 = vpop.f32.mrf.mxu0 }
 0x2f5   : > { %v1421_v62 = vpop.permute.xlu2 %1420 }
 0x2f6   : > { %v1533_v12 = vpop.permute.xlu1 %1532  ;;  %v1291_v28 = vpop.permute.xlu0 %1290 }
 0x2f7   : > { %v1874_v55 = vsel %vm1844_vm4, %v1841_v6, %v1291_v28  ;;  %v1933_v24 = vsel %vm1910_vm6, %v1900_v5, %v1533_v12  ;;  %v2172_v12 = vadd.f32 %v2171_v36, %v4559_v17  ;;  %v4585_v6 = vpop.f32.mrf.mxu1  ;;  %v2211_v36 = vld [vmem:[%s5020_s5 + $0x10] sm:$0xff] }
 0x2f8   : > { %v1907_v22 = vsel %vm1877_vm5, %v1874_v55, %v1419_v33  ;;  %v4563_v43 = vpop.f32.mrf.mxu0 }
 0x2f9   : > { %v2173_v50 = vadd.f32 %v2172_v12, %v4561_v44  ;;  %v2210_v12 = vld [vmem:[%s5020_s5 + $0x8] sm:$0xff] }
 0x2fb   : > { %v2174_v2 = vadd.f32 %v2173_v50, %v4563_v43  ;;  %v2209_v50 = vld [vmem:[%s5020_s5] sm:$0xff] }
 0x2fd   : > { %v783_v18 = vpop.permute.xlu2 %782 }
 0x2fe   : > { %v1547_v7 = vpop.permute.xlu1 %1546  ;;  %v1661_v20 = vpop.permute.xlu0 %1660  ;;  %v1744_v19 = vsel %vm1712_vm0, %v4230_v26, %v783_v18  ;;  %v4658_v18 = vld [vmem:[%s5020_s5 + $0x48] sm:$0xff] }
 0x2ff   : > { %v1940_v53 = vsel %vm1910_vm6, %v1907_v22, %v1547_v7  ;;  %v1966_v14 = vsel %vm1943_vm7, %v1933_v24, %v1661_v20  ;;  %v4593_v7 = vpop.f32.mrf.mxu2  ;;  %v4595_v24 = vpop.f32.mrf.mxu1 }
 0x300   : > { %v1973_v58 = vsel %vm1943_vm7, %v1940_v53, %v1675_v30  ;;  %3035 = vmatmul.msk.f32.gmra.mxu2 %vm1976_vm8, %v1966_v14  ;;  %v4565_v21 = vpop.f32.mrf.mxu0 }
 0x301   : > { %3042 = vmatmul.msk.f32.gmra.mxu3 %vm1976_vm8, %v1973_v58  ;;  %v2175_v30 = vadd.f32 %v2174_v2, %v4565_v21 }
 0x305   : > { %v1167_v15 = vpop.permute.xlu2 %1166 }
 0x306   : > { %v909_v45 = vpop.permute.xlu1 %908  ;;  %v781_v39 = vpop.permute.xlu0 %780 }
 0x307   : > { %v1743_v40 = vsel %vm1712_vm0, %v4108_v35, %v781_v39  ;;  %v4599_v14 = vpop.f32.mrf.mxu2 }
 0x308   : > { %v1776_v10 = vsel %vm1745_vm1, %v1743_v40, %v909_v45  ;;  %v4569_v33 = vpop.f32.mrf.mxu0 }
 0x309   : > { %v1809_v11 = vsel %vm1778_vm2, %v1776_v10, %v1037_v54  ;;  %v2176_v31 = vadd.f32 %v2175_v30, %v4569_v33 }
 0x30d   : > { %v1551_v61 = vpop.permute.xlu2 %1550 }
 0x30e   : > { %v1293_v48 = vpop.permute.xlu1 %1292  ;;  %v1165_v4 = vpop.permute.xlu0 %1164 }
 0x30f   : > { %v1842_v52 = vsel %vm1811_vm3, %v1809_v11, %v1165_v4  ;;  %v4606_v40 = vpop.f32.mrf.mxu2  ;;  %v4624_v4 = vld [vmem:[%s5020_s5 + $0x68] sm:$0xff] }
 0x310   : > { %v1875_v23 = vsel %vm1844_vm4, %v1842_v52, %v1293_v48  ;;  %v4579_v28 = vpop.f32.mrf.mxu0  ;;  %v4612_v48 = vld [vmem:[%s5020_s5 + $0x78] sm:$0xff] }
 0x311   : > { %v1908_v9 = vsel %vm1877_vm5, %v1875_v23, %v1421_v62  ;;  %v2177_v5 = vadd.f32 %v2176_v31, %v4579_v28  ;;  %v4617_v62 = vld [vmem:[%s5020_s5 + $0x70] sm:$0xff]  ;;  %2250 = vmatpush.msrb.mxu1 %v4612_v48  ;;  %2457 = vmatpush.msrb.mxu3 %v4612_v48  ;;  %v4634_v23 = vld [vmem:[%s5020_s5 + $0x60] sm:$0xff] }
 0x313   : > { %2251 = vmatpush.msrb.mxu1 %v4617_v62  ;;  %2458 = vmatpush.msrb.mxu3 %v4617_v62 }
 0x315   : > { %2252 = vmatpush.msrb.mxu1 %v4624_v4  ;;  %2459 = vmatpush.msrb.mxu3 %v4624_v4 }
 0x316   : > { %v1677_v57 = vpop.permute.xlu1 %1676  ;;  %v1549_v60 = vpop.permute.xlu0 %1548 }
 0x317   : > { %v1941_v47 = vsel %vm1910_vm6, %v1908_v9, %v1549_v60  ;;  %v4643_v9 = vld [vmem:[%s5020_s5 + $0x58] sm:$0xff]  ;;  %2253 = vmatpush.msrb.mxu1 %v4634_v23  ;;  %2460 = vmatpush.msrb.mxu3 %v4634_v23 }
 0x318   : > { %v1974_v35 = vsel %vm1943_vm7, %v1941_v47, %v1677_v57  ;;  %v4589_v55 = vpop.f32.mrf.mxu0  ;;  %v4638_v57 = vpop.f32.mrf.mxu3  ;;  %v4651_v47 = vld [vmem:[%s5020_s5 + $0x50] sm:$0xff] }
 0x319   : > { %3043 = vmatmul.msk.f32.gmra.mxu3 %vm1976_vm8, %v1974_v35  ;;  %v2178_v22 = vadd.f32 %v2177_v5, %v4589_v55  ;;  %2254 = vmatpush.msrb.mxu1 %v4643_v9 }
 0x31a   : > { %2461 = vmatpush.msrb.mxu3 %v4643_v9 }
 0x31b   : > { %v2179_v53 = vadd.f32 %v2178_v22, %v4575_v3  ;;  %2255 = vmatpush.msrb.mxu1 %v4651_v47 }
 0x31c   : > { %2462 = vmatpush.msrb.mxu3 %v4651_v47 }
 0x31d   : > { %v2180_v20 = vadd.f32 %v2179_v53, %v4585_v6  ;;  %2256 = vmatpush.msrb.mxu1 %v4658_v18  ;;  %v2300_v53 = vld [vmem:[%s5021_s6 + $0x78] sm:$0xff] }
 0x31e   : > { %v911_v63 = vpop.permute.xlu0 %910  ;;  %v1039_v8 = vpop.permute.xlu1 %1038  ;;  %2463 = vmatpush.msrb.mxu3 %v4658_v18  ;;  %2301 = vmatpush.msrb.mxu2 %v2300_v53 }
 0x31f   : > { %v1777_v34 = vsel %vm1745_vm1, %v1744_v19, %v911_v63  ;;  %v2181_v54 = vadd.f32 %v2180_v20, %v4595_v24  ;;  %v4668_v63 = vld [vmem:[%s5020_s5 + $0x40] sm:$0xff]  ;;  %v2299_v20 = vld [vmem:[%s5021_s6 + $0x70] sm:$0xff] }
 0x320   : > { %v1810_v1 = vsel %vm1778_vm2, %v1777_v34, %v1039_v8  ;;  %v4672_v8 = vpop.f32.mrf.mxu3  ;;  %2257 = vmatpush.msrb.mxu1 %v4668_v63  ;;  %2464 = vmatpush.msrb.mxu3 %v4668_v63 }
 0x321   : > { %v1843_v38 = vsel %vm1811_vm3, %v1810_v1, %v1167_v15  ;;  %2302 = vmatpush.msrb.mxu2 %v2299_v20 }
 0x323   : > { %v4629_v52 = vpop.f32.mrf.mxu2 }
 0x326   : > { %v1295_v32 = vpop.permute.xlu0 %1294  ;;  %v1423_v0 = vpop.permute.xlu1 %1422 }
 0x327   : > { %v1876_v56 = vsel %vm1844_vm4, %v1843_v38, %v1295_v32 }
 0x328   : > { %v1909_v27 = vsel %vm1877_vm5, %v1876_v56, %v1423_v0  ;;  %v2216_v0 = vld [vmem:[%s5020_s5 + $0x38] sm:$0xff] }
 0x329   : > { %v1942_v26 = vsel %vm1910_vm6, %v1909_v27, %v1551_v61  ;;  %2258 = vmatpush.msrb.mxu1 %v2216_v0  ;;  %2465 = vmatpush.msrb.mxu3 %v2216_v0  ;;  %v2215_v27 = vld [vmem:[%s5020_s5 + $0x30] sm:$0xff] }
 0x32b   : > { %2259 = vmatpush.msrb.mxu1 %v2215_v27  ;;  %2466 = vmatpush.msrb.mxu3 %v2215_v27 }
 0x32e   : > { %v1679_v37 = vpop.permute.xlu0 %1678 }
 0x32f   : > { %v1975_v29 = vsel %vm1943_vm7, %v1942_v26, %v1679_v37  ;;  %v2214_v26 = vld [vmem:[%s5020_s5 + $0x28] sm:$0xff] }
 0x330   : > { %3044 = vmatmul.msk.f32.gmra.mxu3 %vm1976_vm8, %v1975_v29  ;;  %2260 = vmatpush.msrb.mxu1 %v2214_v26  ;;  %v2213_v29 = vld [vmem:[%s5020_s5 + $0x20] sm:$0xff] }
 0x331   : > { %2467 = vmatpush.msrb.mxu3 %v2214_v26 }
 0x332   : > { %2261 = vmatpush.msrb.mxu1 %v2213_v29 }
 0x333   : > { %v4681_v38 = vpop.f32.mrf.mxu3  ;;  %2468 = vmatpush.msrb.mxu3 %v2213_v29 }
 0x33d   : > { %v4601_v58 = vpop.f32.mrf.mxu1 }
 0x33e   : > { %v2182_v45 = vadd.f32 %v2181_v54, %v4601_v58 }
 0x340   : > { %v2183_v39 = vadd.f32 %v2182_v45, %v4567_v51  ;;  %v2298_v45 = vld [vmem:[%s5021_s6 + $0x68] sm:$0xff] }
 0x341   : > { %2303 = vmatpush.msrb.mxu2 %v2298_v45 }
 0x342   : > { %v2184_v10 = vadd.f32 %v2183_v39, %v4573_v59 }
 0x344   : > { %v2185_v11 = vadd.f32 %v2184_v10, %v4583_v42 }
 0x346   : > { %v2186_v60 = vadd.f32 %v2185_v11, %v4593_v7  ;;  %v2297_v11 = vld [vmem:[%s5021_s6 + $0x60] sm:$0xff] }
 0x347   : > { %2304 = vmatpush.msrb.mxu2 %v2297_v11 }
 0x348   : > { %v2187_v35 = vadd.f32 %v2186_v60, %v4599_v14 }
 0x34a   : > { %v2188_v34 = vadd.f32 %v2187_v35, %v4606_v40  ;;  %v2296_v35 = vld [vmem:[%s5021_s6 + $0x58] sm:$0xff] }
 0x34b   : > { %2305 = vmatpush.msrb.mxu2 %v2296_v35 }
 0x34c   : > { %v2189_v15 = vadd.f32 %v2188_v34, %v4629_v52 }
 0x354   : > { %v4663_v19 = vpop.f32.mrf.mxu2 }
 0x355   : > { %v2190_v32 = vadd.f32 %v2189_v15, %v4663_v19 }
 0x363   : > { %v4694_v37 = vpop.f32.mrf.mxu3 }
 0x383   : > { %v4678_v1 = vpop.f32.mrf.mxu2 }
 0x384   : > { %v2191_v56 = vadd.f32 %v2190_v32, %v4678_v1  ;;  %v4713_v31 = vpop.f32.mrf.mxu3 }
 0x386   : > { %v2192_v61 = vadd.f32 %v2191_v56, %v4154_v41  ;;  %v2212_v41 = vld [vmem:[%s5020_s5 + $0x18] sm:$0xff]  ;;  %v2295_v56 = vld [vmem:[%s5021_s6 + $0x50] sm:$0xff] }
 0x387   : > { %2262 = vmatpush.msrb.mxu1 %v2212_v41  ;;  %2469 = vmatpush.msrb.mxu3 %v2212_v41 }
 0x388   : > { %v2193_v16 = vadd.f32 %v2192_v61, %v4298_v49  ;;  %v2225_v49 = vadd.f32 %v2210_v12, %v2209_v50  ;;  %2306 = vmatpush.msrb.mxu2 %v2295_v56 }
 0x389   : > { %2263 = vmatpush.msrb.mxu1 %v2211_v36  ;;  %2470 = vmatpush.msrb.mxu3 %v2211_v36 }
 0x38a   : > { %v2194_v2 = vadd.f32 %v2193_v16, %v4638_v57  ;;  %v2226_v30 = vadd.f32 %v2225_v49, %v2211_v36 }
 0x38b   : > { %2264 = vmatpush.msrb.mxu1 %v2210_v12  ;;  %2471 = vmatpush.msrb.mxu3 %v2210_v12 }
 0x38c   : > { %v2227_v5 = vadd.f32 %v2226_v30, %v2212_v41  ;;  %v2195_v22 = vadd.f32 %v2194_v2, %v4672_v8  ;;  %v2292_v41 = vld [vmem:[%s5021_s6 + $0x38] sm:$0xff]  ;;  %v2290_v2 = vld [vmem:[%s5021_s6 + $0x28] sm:$0xff] }
 0x38d   : > { %2265 = vmatpush.msrb.mxu1 %v2209_v50  ;;  %2472 = vmatpush.msrb.mxu3 %v2209_v50 }
 0x38e   : > { %v2228_v54 = vadd.f32 %v2227_v5, %v2213_v29  ;;  %v2196_v10 = vadd.f32 %v2195_v22, %v4681_v38  ;;  %v2293_v29 = vld [vmem:[%s5021_s6 + $0x40] sm:$0xff] }
 0x38f   : > { %2491 = vmatpush.msra.mxu1 %v2300_v53  ;;  %v2289_v5 = vld [vmem:[%s5021_s6 + $0x20] sm:$0xff]  ;;  %v2288_v53 = vld [vmem:[%s5021_s6 + $0x18] sm:$0xff] }
 0x390   : > { %v2229_v39 = vadd.f32 %v2228_v54, %v2214_v26  ;;  %v2197_v32 = vadd.f32 %v2196_v10, %v4694_v37  ;;  %v2286_v10 = vld [vmem:[%s5021_s6 + $0x8] sm:$0xff] }
 0x391   : > { %2492 = vmatpush.msra.mxu1 %v2299_v20 }
 0x392   : > { %v2230_v60 = vadd.f32 %v2229_v39, %v2215_v27  ;;  %v2294_v27 = vld [vmem:[%s5021_s6 + $0x48] sm:$0xff] }
 0x393   : > { %2493 = vmatpush.msra.mxu1 %v2298_v45  ;;  %2307 = vmatpush.msrb.mxu2 %v2294_v27  ;;  %v2287_v45 = vld [vmem:[%s5021_s6 + $0x10] sm:$0xff] }
 0x394   : > { %v2231_v15 = vadd.f32 %v2230_v60, %v2216_v0  ;;  %v2198_v0 = vadd.f32 %v2197_v32, %v4713_v31 }
 0x395   : > { %2494 = vmatpush.msra.mxu1 %v2297_v11  ;;  %2308 = vmatpush.msrb.mxu2 %v2293_v29 }
 0x396   : > { %v2232_v61 = vadd.f32 %v2231_v15, %v4668_v63 }
 0x397   : > { %2495 = vmatpush.msra.mxu1 %v2296_v35  ;;  %2309 = vmatpush.msrb.mxu2 %v2292_v41 }
 0x398   : > { %v2233_v26 = vadd.f32 %v2232_v61, %v4658_v18 }
 0x399   : > { %2496 = vmatpush.msra.mxu1 %v2295_v56 }
 0x39a   : > { %v2234_v16 = vadd.f32 %v2233_v26, %v4651_v47  ;;  %v2291_v47 = vld [vmem:[%s5021_s6 + $0x30] sm:$0xff] }
 0x39b   : > { %2497 = vmatpush.msra.mxu1 %v2294_v27  ;;  %2310 = vmatpush.msrb.mxu2 %v2291_v47 }
 0x39c   : > { %v4732_v34 = vpop.f32.mrf.mxu3  ;;  %v2235_v18 = vadd.f32 %v2234_v16, %v4643_v9 }
 0x39d   : > { %v2199_v63 = vadd.f32 %v2198_v0, %v4732_v34  ;;  %2498 = vmatpush.msra.mxu1 %v2293_v29  ;;  %2311 = vmatpush.msrb.mxu2 %v2290_v2 }
 0x39e   : > { %v2236_v50 = vadd.f32 %v2235_v18, %v4634_v23 }
 0x39f   : > { %2499 = vmatpush.msra.mxu1 %v2292_v41  ;;  %2312 = vmatpush.msrb.mxu2 %v2289_v5 }
 0x3a0   : > { %v2237_v30 = vadd.f32 %v2236_v50, %v4624_v4  ;;  %v2208_v4 = vld [vmem:[%s5017_s2] sm:$0x1] }
 0x3a1   : > { %2500 = vmatpush.msra.mxu1 %v2291_v47  ;;  %2313 = vmatpush.msrb.mxu2 %v2288_v53  ;;  %v2248_v39 = vmul.f32 256.0, %v2208_v4 }
 0x3a2   : > { %v2238_v22 = vadd.f32 %v2237_v30, %v4617_v62 }
 0x3a3   : > { %2501 = vmatpush.msra.mxu1 %v2290_v2  ;;  %2314 = vmatpush.msrb.mxu2 %v2287_v45 }
 0x3a4   : > { %v2239_v20 = vadd.f32 %v2238_v22, %v4612_v48  ;;  %v2285_v48 = vld [vmem:[%s5021_s6] sm:$0xff] }
 0x3a5   : > { %2502 = vmatpush.msra.mxu1 %v2289_v5  ;;  %2315 = vmatpush.msrb.mxu2 %v2286_v10 }
 0x3a6   : > { %v2240_v35 = vrot.slane %v2239_v20, 4 }
 0x3a7   : > { %2503 = vmatpush.msra.mxu1 %v2288_v53  ;;  %2316 = vmatpush.msrb.mxu2 %v2285_v48 }
 0x3a8   : > { %v2241_v15 = vadd.f32 %v2240_v35, %v2239_v20 }
 0x3a9   : > { %2504 = vmatpush.msra.mxu1 %v2287_v45 }
 0x3aa   : > { %v2242_v32 = vrot.slane %v2241_v15, 2 }
 0x3ab   : > { %2505 = vmatpush.msra.mxu1 %v2286_v10 }
 0x3ac   : > { %v2243_v56 = vadd.f32 %v2242_v32, %v2241_v15 }
 0x3ad   : > { %2506 = vmatpush.msra.mxu1 %v2285_v48 }
 0x3ae   : > { %v2244_v61 = vrot.slane %v2243_v56, 1 }
 0x3b0   : > { %v4784_v27 = vadd.f32 %v2244_v61, %v2243_v56 }
 0x3b2   : > { %v2246_v26 = vmul.f32 256.0, %v4784_v27  ;;  %vm2478_vm15 = vcmp.gt.f32.partialorder %v4784_v27, 0.0 }
 0x3b3   : > { %v4752_v36 = vpop.f32.mrf.mxu3 }
 0x3b4   : > { %v2200_v12 = vadd.f32 %v2199_v63, %v4752_v36  ;;  %v2247_v0 = vmax.f32 %v2246_v26, 1.0 }
 0x3b6   : > { %v2201_v49 = vrot.slane %v2200_v12, 4  ;;  %3130 = vrcp.f32 %v2247_v0  ;;  %vm2275_vm9 = vweird.f32 %v2247_v0  ;;  %v2281_v18 = vand.u32 2147483648, %v2247_v0 }
 0x3b7   : > { %v2279_v47 = vand.u32 2147483647, %v2247_v0 }
 0x3b8   : > { %v2202_v9 = vadd.f32 %v2201_v49, %v2200_v12  ;;  %v2282_v50 = vor.u32 1.1754944e-38, %v2281_v18 }
 0x3b9   : > { %vm2280_vm12 = vcmp.eq.f32.partialorder %v2279_v47, 8.507059e+37 }
 0x3ba   : > { %v2203_v23 = vrot.slane %v2202_v9, 2 }
 0x3bc   : > { %v2204_v54 = vadd.f32 %v2203_v23, %v2202_v9  ;;  %v3131_v29 = vpop.eup %3130 }
 0x3bd   : > { %v2271_v16 = vmul.f32 %v3131_v29, %v2247_v0  ;;  %vm2276_vm10 = vweird.f32 %v3131_v29 }
 0x3be   : > { %v2205_v62 = vrot.slane %v2204_v54, 1  ;;  %vm2277_vm11 = vmor %vm2275_vm9, %vm2276_vm10 }
 0x3bf   : > { %v2272_v63 = vsub.f32 1.0, %v2271_v16 }
 0x3c0   : > { %v2206_v11 = vadd.f32 %v2205_v62, %v2204_v54 }
 0x3c1   : > { %v2273_v41 = vmul.f32 %v3131_v29, %v2272_v63 }
 0x3c2   : > { %v2249_v60 = vadd.f32 %v2248_v39, %v2206_v11 }
 0x3c3   : > { %v2274_v12 = vadd.f32 %v3131_v29, %v2273_v41 }
 0x3c4   : > { %2266 = vmatmul.f32.vlgmr.msrb.gmra.mxu1 %v2249_v60 }
 0x3c5   : > { %v2278_v49 = vsel %vm2277_vm11, %v3131_v29, %v2274_v12 }
 0x3c6   : > { %v4787_v2 = vsel %vm2280_vm12, %v2282_v50, %v2278_v49 }
 0x441   : > { %v2267_v30 = vpop.f32.mrf.mxu1 }
 0x442   : > { %v2284_v9 = vmul.f32 %v4787_v2, %v2267_v30 }
 0x444   : > { %2317 = vmatmul.f32.vlgmr.msrb.gmra.mxu2 %v2284_v9 }
 0x4c7   : > { %v2318_v5 = vpop.f32.mrf.mxu2 }
 0x4c8   : > { %v4790_v22 = vsub.f32 %v2318_v5, %v2208_v4 }
 0x4ca   : > { %v4793_v23 = vperm.slane %v4790_v22, 0 }
 0x4cc   : > { %v2355_v53 = vsub.f32 %v4543_v13, %v4793_v23  ;;  %v2356_v20 = vsub.f32 %v4549_v46, %v4793_v23  ;;  %v2357_v54 = vsub.f32 %v4554_v25, %v4793_v23  ;;  %v2358_v39 = vsub.f32 %v4559_v17, %v4793_v23 }
 0x4cd   : > { %v2359_v4 = vsub.f32 %v4561_v44, %v4793_v23  ;;  %v2360_v48 = vsub.f32 %v4563_v43, %v4793_v23  ;;  %v2361_v15 = vsub.f32 %v4565_v21, %v4793_v23  ;;  %v2362_v61 = vsub.f32 %v4569_v33, %v4793_v23 }
 0x4ce   : > { %v2387_v45 = vmul.f32 %v2355_v53, %v2355_v53  ;;  %v2388_v62 = vmul.f32 %v2356_v20, %v2356_v20  ;;  %v2389_v10 = vmul.f32 %v2357_v54, %v2357_v54  ;;  %v2390_v60 = vmul.f32 %v2358_v39, %v2358_v39 }
 0x4cf   : > { %v2391_v32 = vmul.f32 %v2359_v4, %v2359_v4  ;;  %v2392_v26 = vmul.f32 %v2360_v48, %v2360_v48  ;;  %v2363_v29 = vsub.f32 %v4579_v28, %v4793_v23  ;;  %v2393_v16 = vmul.f32 %v2361_v15, %v2361_v15 }
 0x4d0   : > { %v2419_v11 = vadd.f32 %v2388_v62, %v2387_v45  ;;  %v2364_v41 = vsub.f32 %v4589_v55, %v4793_v23  ;;  %v2394_v18 = vmul.f32 %v2362_v61, %v2362_v61  ;;  %v2365_v47 = vsub.f32 %v4575_v3, %v4793_v23 }
 0x4d1   : > { %v2395_v50 = vmul.f32 %v2363_v29, %v2363_v29  ;;  %v2366_v30 = vsub.f32 %v4585_v6, %v4793_v23  ;;  %v2367_v53 = vsub.f32 %v4595_v24, %v4793_v23  ;;  %v2368_v45 = vsub.f32 %v4601_v58, %v4793_v23 }
 0x4d2   : > { %v2420_v35 = vadd.f32 %v2419_v11, %v2389_v10  ;;  %v2396_v9 = vmul.f32 %v2364_v41, %v2364_v41  ;;  %v2397_v20 = vmul.f32 %v2365_v47, %v2365_v47  ;;  %v2369_v4 = vsub.f32 %v4567_v51, %v4793_v23 }
 0x4d3   : > { %v2398_v62 = vmul.f32 %v2366_v30, %v2366_v30  ;;  %v2399_v10 = vmul.f32 %v2367_v53, %v2367_v53  ;;  %v2370_v48 = vsub.f32 %v4573_v59, %v4793_v23  ;;  %v2371_v15 = vsub.f32 %v4583_v42, %v4793_v23 }
 0x4d4   : > { %v2421_v56 = vadd.f32 %v2420_v35, %v2390_v60  ;;  %v2400_v60 = vmul.f32 %v2368_v45, %v2368_v45  ;;  %v2372_v61 = vsub.f32 %v4593_v7, %v4793_v23  ;;  %v2373_v29 = vsub.f32 %v4599_v14, %v4793_v23  ;;  %v4842_v45 = vld [vmem:[%s4151_s22 + $0xb8] sm:$0xff] }
 0x4d5   : > { %v2374_v41 = vsub.f32 %v4606_v40, %v4793_v23  ;;  %v2376_v30 = vsub.f32 %v4663_v19, %v4793_v23  ;;  %v2377_v53 = vsub.f32 %v4678_v1, %v4793_v23 }
 0x4d6   : > { %v2422_v0 = vadd.f32 %v2421_v56, %v2391_v32  ;;  %v2401_v32 = vmul.f32 %v2369_v4, %v2369_v4  ;;  %v2405_v47 = vmul.f32 %v2373_v29, %v2373_v29 }
 0x4d8   : > { %v2423_v63 = vadd.f32 %v2422_v0, %v2392_v26  ;;  %v2402_v26 = vmul.f32 %v2370_v48, %v2370_v48  ;;  %v2409_v48 = vmul.f32 %v2377_v53, %v2377_v53 }
 0x4da   : > { %v2424_v12 = vadd.f32 %v2423_v63, %v2393_v16  ;;  %v2403_v16 = vmul.f32 %v2371_v15, %v2371_v15 }
 0x4dc   : > { %v2425_v49 = vadd.f32 %v2424_v12, %v2394_v18  ;;  %v2404_v18 = vmul.f32 %v2372_v61, %v2372_v61 }
 0x4de   : > { %v2426_v5 = vadd.f32 %v2425_v49, %v2395_v50  ;;  %v2375_v50 = vsub.f32 %v4629_v52, %v4793_v23 }
 0x4e0   : > { %v2427_v54 = vadd.f32 %v2426_v5, %v2396_v9  ;;  %v2406_v9 = vmul.f32 %v2374_v41, %v2374_v41 }
 0x4e2   : > { %v2428_v39 = vadd.f32 %v2427_v54, %v2397_v20  ;;  %v2407_v20 = vmul.f32 %v2375_v50, %v2375_v50 }
 0x4e4   : > { %v2429_v11 = vadd.f32 %v2428_v39, %v2398_v62  ;;  %v2378_v62 = vsub.f32 %v4842_v45, %v4793_v23  ;;  %v2408_v39 = vmul.f32 %v2376_v30, %v2376_v30 }
 0x4e6   : > { %v2430_v35 = vadd.f32 %v2429_v11, %v2399_v10  ;;  %v4847_v10 = vld [vmem:[%s4151_s22 + $0xc0] sm:$0xff]  ;;  %v2410_v15 = vmul.f32 %v2378_v62, %v2378_v62 }
 0x4e7   : > { %v2379_v11 = vsub.f32 %v4847_v10, %v4793_v23 }
 0x4e8   : > { %v2431_v56 = vadd.f32 %v2430_v35, %v2400_v60  ;;  %v2380_v35 = vsub.f32 %v4638_v57, %v4793_v23 }
 0x4e9   : > { %v2411_v61 = vmul.f32 %v2379_v11, %v2379_v11 }
 0x4ea   : > { %v2432_v0 = vadd.f32 %v2431_v56, %v2401_v32  ;;  %v2381_v56 = vsub.f32 %v4672_v8, %v4793_v23  ;;  %v2412_v29 = vmul.f32 %v2380_v35, %v2380_v35 }
 0x4ec   : > { %v2433_v63 = vadd.f32 %v2432_v0, %v2402_v26  ;;  %v2382_v0 = vsub.f32 %v4681_v38, %v4793_v23  ;;  %v2413_v41 = vmul.f32 %v2381_v56, %v2381_v56 }
 0x4ee   : > { %v2434_v12 = vadd.f32 %v2433_v63, %v2403_v16  ;;  %v2383_v63 = vsub.f32 %v4694_v37, %v4793_v23 }
 0x4f0   : > { %v2435_v49 = vadd.f32 %v2434_v12, %v2404_v18  ;;  %v2384_v12 = vsub.f32 %v4713_v31, %v4793_v23  ;;  %v2415_v30 = vmul.f32 %v2383_v63, %v2383_v63 }
 0x4f2   : > { %v2436_v5 = vadd.f32 %v2435_v49, %v2405_v47  ;;  %v2414_v47 = vmul.f32 %v2382_v0, %v2382_v0  ;;  %v2385_v49 = vsub.f32 %v4732_v34, %v4793_v23  ;;  %v2416_v53 = vmul.f32 %v2384_v12, %v2384_v12 }
 0x4f4   : > { %v2437_v54 = vadd.f32 %v2436_v5, %v2406_v9  ;;  %v2386_v5 = vsub.f32 %v4752_v36, %v4793_v23 }
 0x4f6   : > { %v2438_v4 = vadd.f32 %v2437_v54, %v2407_v20  ;;  %v2417_v54 = vmul.f32 %v2385_v49, %v2385_v49 }
 0x4f8   : > { %v2439_v60 = vadd.f32 %v2438_v4, %v2408_v39  ;;  %v2418_v39 = vmul.f32 %v2386_v5, %v2386_v5 }
 0x4fa   : > { %v2440_v32 = vadd.f32 %v2439_v60, %v2409_v48 }
 0x4fc   : > { %v2441_v26 = vadd.f32 %v2440_v32, %v2410_v15 }
 0x4fe   : > { %v2442_v16 = vadd.f32 %v2441_v26, %v2411_v61 }
 0x500   : > { %v2443_v18 = vadd.f32 %v2442_v16, %v2412_v29 }
 0x502   : > { %v2444_v50 = vadd.f32 %v2443_v18, %v2413_v41 }
 0x504   : > { %v2445_v9 = vadd.f32 %v2444_v50, %v2414_v47 }
 0x506   : > { %v2446_v20 = vadd.f32 %v2445_v9, %v2415_v30  ;;  %v2513_v30 = vld [vmem:[%s5019_s4] sm:$0x1] }
 0x508   : > { %v2447_v62 = vadd.f32 %v2446_v20, %v2416_v53 }
 0x50a   : > { %v2448_v4 = vadd.f32 %v2447_v62, %v2417_v54 }
 0x50c   : > { %v2449_v11 = vadd.f32 %v2448_v4, %v2418_v39 }
 0x50e   : > { %v2450_v48 = vrot.slane %v2449_v11, 4 }
 0x510   : > { %v2451_v60 = vadd.f32 %v2450_v48, %v2449_v11 }
 0x512   : > { %v2452_v35 = vrot.slane %v2451_v60, 2 }
 0x514   : > { %v2453_v15 = vadd.f32 %v2452_v35, %v2451_v60 }
 0x516   : > { %v2454_v32 = vrot.slane %v2453_v15, 1 }
 0x518   : > { %v2455_v56 = vadd.f32 %v2454_v32, %v2453_v15 }
 0x51a   : > { %2473 = vmatmul.f32.vlgmr.msrb.gmra.mxu3 %v2455_v56 }
 0x59d   : > { %v2474_v61 = vpop.f32.mrf.mxu3 }
 0x59e   : > { %v2477_v26 = vmul.f32 %v2474_v61, %v4787_v2  ;;  %v2511_v2 = vld [vmem:[%s5018_s3] sm:$0x1] }
 0x5a0   : > { %v2479_v0 = vadd.f32 1e-05, %v2477_v26 }
 0x5a2   : > { %3132 = vrsqrt.f32 %v2479_v0  ;;  %vm2486_vm14 = vweird.f32 %v2479_v0 }
 0x5a8   : > { %v3133_v23 = vpop.eup %3132 }
 0x5a9   : > { %v2481_v29 = vmul.f32 %v3133_v23, %v2479_v0  ;;  %vm2487_vm13 = vweird.f32 %v3133_v23 }
 0x5aa   : > { %vm2488_vm0 = vmor %vm2486_vm14, %vm2487_vm13 }
 0x5ab   : > { %v2482_v16 = vmul.f32 %v3133_v23, %v2481_v29 }
 0x5ad   : > { %v2483_v63 = vmul.f32 0.5, %v2482_v16 }
 0x5af   : > { %v2484_v41 = vsub.f32 1.5, %v2483_v63 }
 0x5b1   : > { %v2485_v18 = vmul.f32 %v3133_v23, %v2484_v41 }
 0x5b3   : > { %v2489_v12 = vsel %vm2488_vm0, %v3133_v23, %v2485_v18 }
 0x5b4   : > { %3045 = vmatmul.msk.f32.vlgmr.msra.gmra.mxu1 %vm2478_vm15, %v2489_v12 }
 0x631   : > { %v2508_v47 = vpop.f32.mrf.mxu1 }
 0x632   : > { %v2512_v50 = vmul.f32 %v2511_v2, %v2508_v47 }
 0x634   : > { %v2514_v49 = vmul.f32 %v2512_v50, %v4790_v22  ;;  %v4874_v5 = vperm.slane %v2512_v50, 0 }
 0x636   : > { %v2515_v9 = vsub.f32 %v2513_v30, %v2514_v49  ;;  %v2517_v53 = vmul.f32 %v4874_v5, %v4543_v13  ;;  %v2518_v20 = vmul.f32 %v4874_v5, %v4549_v46  ;;  %v2519_v54 = vmul.f32 %v4874_v5, %v4554_v25 }
 0x637   : > { %v2520_v22 = vmul.f32 %v4874_v5, %v4559_v17  ;;  %v2521_v62 = vmul.f32 %v4874_v5, %v4561_v44  ;;  %v2522_v13 = vmul.f32 %v4874_v5, %v4563_v43  ;;  %v2523_v25 = vmul.f32 %v4874_v5, %v4565_v21 }
 0x638   : > { %v4876_v27 = vperm.slane %v2515_v9, 0  ;;  %v2524_v44 = vmul.f32 %v4874_v5, %v4569_v33  ;;  %v2525_v48 = vmul.f32 %v4874_v5, %v4579_v28  ;;  %v2526_v21 = vmul.f32 %v4874_v5, %v4589_v55 }
 0x639   : > { %v2527_v33 = vmul.f32 %v4874_v5, %v4575_v3  ;;  %v2528_v0 = vmul.f32 %v4874_v5, %v4585_v6  ;;  %v2529_v55 = vmul.f32 %v4874_v5, %v4595_v24  ;;  %v2530_v3 = vmul.f32 %v4874_v5, %v4601_v58 }
 0x63a   : > { %v2552_v39 = vadd.f32 %v4876_v27, %v2517_v53  ;;  %v2553_v4 = vadd.f32 %v4876_v27, %v2518_v20  ;;  %v2554_v11 = vadd.f32 %v4876_v27, %v2519_v54  ;;  %v2555_v46 = vadd.f32 %v4876_v27, %v2520_v22 }
 0x63b   : > { %v2556_v17 = vadd.f32 %v4876_v27, %v2521_v62  ;;  %v2557_v60 = vadd.f32 %v4876_v27, %v2522_v13  ;;  %v2558_v35 = vadd.f32 %v4876_v27, %v2523_v25  ;;  %v2559_v56 = vadd.f32 %v4876_v27, %v2524_v44 }
 0x63c   : > { %v2584_v43 = vmax.f32 %v2552_v39, 0.0  ;;  %v2585_v15 = vmax.f32 %v2553_v4, 0.0  ;;  %v2586_v32 = vmax.f32 %v2554_v11, 0.0  ;;  %v2587_v61 = vmax.f32 %v2555_v46, 0.0 }
 0x63d   : > { %v2560_v28 = vadd.f32 %v4876_v27, %v2525_v48  ;;  %v2588_v26 = vmax.f32 %v2556_v17, 0.0  ;;  %v2561_v23 = vadd.f32 %v4876_v27, %v2526_v21  ;;  %v2589_v29 = vmax.f32 %v2557_v60, 0.0 }
 0x63e   : > { %2616 = vst [vmem:[%s4151_s22] sm:$0xff] %v2584_v43  ;;  %v2562_v16 = vadd.f32 %v4876_v27, %v2527_v33  ;;  %v2590_v63 = vmax.f32 %v2558_v35, 0.0  ;;  %v2563_v41 = vadd.f32 %v4876_v27, %v2528_v0  ;;  %v2591_v18 = vmax.f32 %v2559_v56, 0.0 }
 0x63f   : > { %2617 = vst [vmem:[%s4151_s22 + $0x8] sm:$0xff] %v2585_v15  ;;  %v2531_v6 = vmul.f32 %v4874_v5, %v4567_v51  ;;  %v2564_v12 = vadd.f32 %v4876_v27, %v2529_v55  ;;  %v2592_v47 = vmax.f32 %v2560_v28, 0.0  ;;  %v2532_v24 = vmul.f32 %v4874_v5, %v4573_v59 }
 0x640   : > { %2618 = vst [vmem:[%s4151_s22 + $0x10] sm:$0xff] %v2586_v32  ;;  %v2565_v2 = vadd.f32 %v4876_v27, %v2530_v3  ;;  %v2593_v50 = vmax.f32 %v2561_v23, 0.0  ;;  %v2533_v58 = vmul.f32 %v4874_v5, %v4583_v42  ;;  %v2594_v30 = vmax.f32 %v2562_v16, 0.0 }
 0x641   : > { %2619 = vst [vmem:[%s4151_s22 + $0x18] sm:$0xff] %v2587_v61  ;;  %v2566_v49 = vadd.f32 %v4876_v27, %v2531_v6  ;;  %v2534_v51 = vmul.f32 %v4874_v5, %v4593_v7  ;;  %v2567_v9 = vadd.f32 %v4876_v27, %v2532_v24  ;;  %v2595_v53 = vmax.f32 %v2563_v41, 0.0 }
 0x642   : > { %2620 = vst [vmem:[%s4151_s22 + $0x20] sm:$0xff] %v2588_v26  ;;  %v2535_v59 = vmul.f32 %v4874_v5, %v4599_v14  ;;  %v2568_v20 = vadd.f32 %v4876_v27, %v2533_v58  ;;  %v2596_v54 = vmax.f32 %v2564_v12, 0.0  ;;  %v2536_v42 = vmul.f32 %v4874_v5, %v4606_v40 }
 0x643   : > { %2621 = vst [vmem:[%s4151_s22 + $0x28] sm:$0xff] %v2589_v29  ;;  %v2569_v22 = vadd.f32 %v4876_v27, %v2534_v51  ;;  %v2597_v62 = vmax.f32 %v2565_v2, 0.0  ;;  %v2537_v7 = vmul.f32 %v4874_v5, %v4629_v52  ;;  %v2598_v4 = vmax.f32 %v2566_v49, 0.0 }
 0x644   : > { %2622 = vst [vmem:[%s4151_s22 + $0x30] sm:$0xff] %v2590_v63  ;;  %v2570_v39 = vadd.f32 %v4876_v27, %v2535_v59  ;;  %v2538_v14 = vmul.f32 %v4874_v5, %v4663_v19  ;;  %v2571_v11 = vadd.f32 %v4876_v27, %v2536_v42  ;;  %v2599_v13 = vmax.f32 %v2567_v9, 0.0 }
 0x645   : > { %2623 = vst [vmem:[%s4151_s22 + $0x38] sm:$0xff] %v2591_v18  ;;  %v2539_v40 = vmul.f32 %v4874_v5, %v4678_v1  ;;  %v2572_v46 = vadd.f32 %v4876_v27, %v2537_v7  ;;  %v2600_v25 = vmax.f32 %v2568_v20, 0.0  ;;  %v2540_v52 = vmul.f32 %v4874_v5, %v4842_v45 }
 0x646   : > { %2624 = vst [vmem:[%s4151_s22 + $0x40] sm:$0xff] %v2592_v47  ;;  %v2573_v17 = vadd.f32 %v4876_v27, %v2538_v14  ;;  %v2601_v44 = vmax.f32 %v2569_v22, 0.0  ;;  %v2541_v19 = vmul.f32 %v4874_v5, %v4847_v10  ;;  %v2602_v60 = vmax.f32 %v2570_v39, 0.0 }
 0x647   : > { %2625 = vst [vmem:[%s4151_s22 + $0x48] sm:$0xff] %v2593_v50  ;;  %v2574_v48 = vadd.f32 %v4876_v27, %v2539_v40  ;;  %v2542_v1 = vmul.f32 %v4874_v5, %v4638_v57  ;;  %v2575_v35 = vadd.f32 %v4876_v27, %v2540_v52  ;;  %v2603_v43 = vmax.f32 %v2571_v11, 0.0 }
 0x648   : > { %2626 = vst [vmem:[%s4151_s22 + $0x50] sm:$0xff] %v2594_v30  ;;  %v2543_v45 = vmul.f32 %v4874_v5, %v4672_v8  ;;  %v2576_v15 = vadd.f32 %v4876_v27, %v2541_v19  ;;  %v2604_v32 = vmax.f32 %v2572_v46, 0.0  ;;  %v2544_v10 = vmul.f32 %v4874_v5, %v4681_v38 }
 0x649   : > { %2627 = vst [vmem:[%s4151_s22 + $0x58] sm:$0xff] %v2595_v53  ;;  %v2577_v21 = vadd.f32 %v4876_v27, %v2542_v1  ;;  %v2605_v56 = vmax.f32 %v2573_v17, 0.0  ;;  %v2545_v57 = vmul.f32 %v4874_v5, %v4694_v37  ;;  %v2606_v33 = vmax.f32 %v2574_v48, 0.0 }
 0x64a   : > { %2628 = vst [vmem:[%s4151_s22 + $0x60] sm:$0xff] %v2596_v54  ;;  %v2578_v61 = vadd.f32 %v4876_v27, %v2543_v45  ;;  %v2546_v8 = vmul.f32 %v4874_v5, %v4713_v31  ;;  %v2579_v28 = vadd.f32 %v4876_v27, %v2544_v10  ;;  %v2607_v38 = vmax.f32 %v2575_v35, 0.0 }
 0x64b   : > { %2629 = vst [vmem:[%s4151_s22 + $0x68] sm:$0xff] %v2597_v62  ;;  %v2547_v26 = vmul.f32 %v4874_v5, %v4732_v34  ;;  %v2580_v0 = vadd.f32 %v4876_v27, %v2545_v57  ;;  %v2608_v37 = vmax.f32 %v2576_v15, 0.0  ;;  %v2548_v23 = vmul.f32 %v4874_v5, %v4752_v36 }
 0x64c   : > { %2630 = vst [vmem:[%s4151_s22 + $0x70] sm:$0xff] %v2598_v4  ;;  %v2581_v31 = vadd.f32 %v4876_v27, %v2546_v8  ;;  %v2609_v29 = vmax.f32 %v2577_v21, 0.0  ;;  %v2610_v34 = vmax.f32 %v2578_v61, 0.0  ;;  %v2611_v63 = vmax.f32 %v2579_v28, 0.0 }
 0x64d   : > { %2631 = vst [vmem:[%s4151_s22 + $0x78] sm:$0xff] %v2599_v13  ;;  %v2582_v55 = vadd.f32 %v4876_v27, %v2547_v26  ;;  %v2583_v16 = vadd.f32 %v4876_v27, %v2548_v23  ;;  %v2612_v3 = vmax.f32 %v2580_v0, 0.0 }
 0x64e   : > { %2632 = vst [vmem:[%s4151_s22 + $0x80] sm:$0xff] %v2600_v25  ;;  %v2613_v36 = vmax.f32 %v2581_v31, 0.0 }
 0x64f   : > { %2633 = vst [vmem:[%s4151_s22 + $0x88] sm:$0xff] %v2601_v44  ;;  %v2614_v5 = vmax.f32 %v2582_v55, 0.0  ;;  %v2615_v41 = vmax.f32 %v2583_v16, 0.0 }
 0x650   : > { %2634 = vst [vmem:[%s4151_s22 + $0x90] sm:$0xff] %v2602_v60 }
 0x651   : > { %2635 = vst [vmem:[%s4151_s22 + $0x98] sm:$0xff] %v2603_v43 }
 0x652   : > { %2636 = vst [vmem:[%s4151_s22 + $0xa0] sm:$0xff] %v2604_v32 }
 0x653   : > { %2637 = vst [vmem:[%s4151_s22 + $0xa8] sm:$0xff] %v2605_v56 }
 0x654   : > { %2638 = vst [vmem:[%s4151_s22 + $0xb0] sm:$0xff] %v2606_v33 }
 0x655   : > { %2639 = vst [vmem:[%s4151_s22 + $0xb8] sm:$0xff] %v2607_v38 }
 0x656   : > { %2640 = vst [vmem:[%s4151_s22 + $0xc0] sm:$0xff] %v2608_v37 }
 0x657   : > { %2641 = vst [vmem:[%s4151_s22 + $0xc8] sm:$0xff] %v2609_v29 }
 0x658   : > { %2642 = vst [vmem:[%s4151_s22 + $0xd0] sm:$0xff] %v2610_v34 }
 0x659   : > { %2643 = vst [vmem:[%s4151_s22 + $0xd8] sm:$0xff] %v2611_v63 }
 0x65a   : > { %2644 = vst [vmem:[%s4151_s22 + $0xe0] sm:$0xff] %v2612_v3 }
 0x65b   : > { %2645 = vst [vmem:[%s4151_s22 + $0xe8] sm:$0xff] %v2613_v36 }
 0x65c   : > { %2646 = vst [vmem:[%s4151_s22 + $0xf0] sm:$0xff] %v2614_v5 }
 0x65d   : > { %2647 = vst [vmem:[%s4151_s22 + $0xf8] sm:$0xff] %v2615_v41 }
 0x65e PF: > { %s17_s26 = sadd.s32 1, %s3156_s26   ;;  %s5029_s24 = smov %s3152_s25 }
 0x65f   : > { %p14_p5 = scmp.ge.s32.totalorder %s17_s26, 4   ;;  %s5030_s25 = smov %s5032_s27 }
 0x661   :  { %16 = sbr.rel (!%p14_p5) target bundleno = 2 (0x2), region = 98 }

</bundles_post_ra>
